<compile_context>
chip_gen: v6e
topology: v6e:2x2x1
jax: 0.10.0
libtpu: 0.0.40
codegen_flags: <defaults>
</compile_context>

<pallas_src>
import math
import functools

import jax
import jax.numpy as jnp
from jax import lax
from jax.experimental import pallas as pl
from jax.experimental.pallas import tpu as pltpu


def _attention_group_kernel(q_ref, k_ref, v_ref, o_ref, m_ref, l_ref, acc_ref,
                            *, mxu_dtype, exp_dtype, precision):
    """One (batch, head-group, kv-tile) grid step.

    q_ref : (hb, seq, D)  resident across the kv axis, pre-scaled by the softmax scale
    k_ref : (hb, Tk,  D)
    v_ref : (hb, Tk,  D)
    o_ref : (hb, seq, D)  written once, at the last kv step
    m/l   : (hb, seq, 1)  f32 running max / running denominator
    acc   : (hb, seq, D)  f32 running numerator
    """
    t = pl.program_id(2)

    @pl.when(t == 0)
    def _init():
        m_ref[...] = jnp.full(m_ref.shape, -jnp.inf, dtype=m_ref.dtype)
        l_ref[...] = jnp.zeros(l_ref.shape, dtype=l_ref.dtype)
        acc_ref[...] = jnp.zeros(acc_ref.shape, dtype=acc_ref.dtype)

    q = q_ref[...]
    k = k_ref[...]
    v = v_ref[...]
    if mxu_dtype is not None:
        q = q.astype(mxu_dtype)
        k = k.astype(mxu_dtype)
        v = v.astype(mxu_dtype)

    # Batched-over-heads NT contraction on the MXU, f32 accumulation.
    s = jnp.einsum("hqd,hkd->hqk", q, k,
                   preferred_element_type=jnp.float32, precision=precision)

    # Online (flash-style) softmax update in f32.
    m_prev = m_ref[...]
    m_new = jnp.maximum(m_prev, jnp.max(s, axis=-1, keepdims=True))
    alpha = jnp.exp(m_prev - m_new)

    if exp_dtype is not None:
        p = jnp.exp((s - m_new).astype(exp_dtype))
        row_sum = jnp.sum(p.astype(jnp.float32), axis=-1, keepdims=True)
    else:
        p = jnp.exp(s - m_new)
        row_sum = jnp.sum(p, axis=-1, keepdims=True)

    l_ref[...] = alpha * l_ref[...] + row_sum
    pv = jnp.einsum("hqk,hkd->hqd", p.astype(v.dtype), v,
                    preferred_element_type=jnp.float32, precision=precision)
    acc_ref[...] = alpha * acc_ref[...] + pv
    m_ref[...] = m_new

    @pl.when(t == pl.num_programs(2) - 1)
    def _finalize():
        denom = l_ref[...]
        inv = pl.reciprocal(denom, approx=True)
        inv = inv * (2.0 - denom * inv)      # one Newton step -> near-exact
        o_ref[...] = (acc_ref[...] * inv).astype(o_ref.dtype)


def _divisors(n):
    return [d for d in range(1, n + 1) if n % d == 0]


def _vmem_capacity_bytes():
    try:
        cap = getattr(pltpu.get_tpu_info(), "vmem_capacity_bytes", None)
        if cap:
            return int(cap)
    except Exception:
        pass
    return 64 << 20   # conservative fallback (v7x per-core VMEM)


def _select_tiles(bs, num_heads, seq, head_dim, itemsize,
                  heads_per_block=None, kv_block=None):
    """Pick (heads_per_block, kv_block, vmem_limit_bytes), generation-aware."""
    cap = max(_vmem_capacity_bytes(), 32 << 20)
    limit_cap = (cap * 3) // 4          # ~48 MiB on v7x, ~96 MiB on v5e/v6e
    budget = (cap * 9) // 20            # ~45% of physical VMEM per grid step

    def rup(n, m):
        return -(-n // m) * m

    d_pad = rup(head_dim, 128)
    s_pad = rup(seq, 8)

    def step_bytes(hb, tk):
        tk_lane = rup(tk, 128)
        tk_sub = rup(tk, 8)
        io = 2 * itemsize * (hb * s_pad * d_pad            # q window (2x buffered)
                             + 2 * hb * tk_sub * d_pad     # k + v windows
                             + hb * s_pad * d_pad)         # out window
        scratch = 4 * (2 * hb * s_pad * 128                # m, l (lane-padded)
                       + hb * s_pad * d_pad)               # f32 accumulator
        temps = 4 * (3 * hb * s_pad * tk_lane              # s, p co-live + exp temp
                     + hb * s_pad * d_pad)                 # p @ v product
        return io + scratch + temps

    if heads_per_block is not None:
        assert num_heads % heads_per_block == 0, "heads_per_block must divide num_heads"
        hb_cands = [heads_per_block]
    else:
        divs = _divisors(num_heads)
        hb_cap = num_heads
        if bs == 1 and num_heads > 1:
            # Keep >= 2 parallel grid steps so both v7x TensorCores get work.
            hb_cap = max(d for d in divs if d < num_heads)
        hb_cands = sorted((d for d in divs if d <= hb_cap), reverse=True)

    if kv_block is not None:
        assert seq % kv_block == 0, "kv_block must divide seq"
        assert kv_block == seq or kv_block % 8 == 0, "kv_block must be seq or a multiple of 8"
        kv_cands = [kv_block]
    else:
        kv_cands = [seq] + sorted((d for d in _divisors(seq)
                                   if d % 128 == 0 and d != seq), reverse=True)

    choice = None
    for hb in hb_cands:
        for tk in kv_cands:
            if step_bytes(hb, tk) <= budget:
                choice = (hb, tk)
                break
        if choice is not None:
            break
    if choice is None:
        # TODO(synk): query tiling for extremely long sequences; fall back to
        # the smallest configuration and let Mosaic spill if it must.
        choice = (hb_cands[-1], kv_cands[-1])

    hb, tk = choice
    vmem_limit = int(min(limit_cap,
                         max(16 << 20, step_bytes(hb, tk) * 5 // 4 + (2 << 20))))
    return hb, tk, vmem_limit


def qkv_multihead_attention(qkv, *, num_heads: int, use_sdpa: bool,
                            heads_per_block: int | None = None,
                            kv_block: int | None = None,
                            mxu_dtype=None, exp_dtype=None,
                            precision=lax.Precision.HIGHEST):
    """JAX/Pallas equivalent of QKVMultiheadAttention.forward.

    mxu_dtype : cast q/k/v/p to this dtype for the MXU matmuls (e.g.
                jnp.bfloat16 for f32 inputs on v5e).  None = input dtype.
    exp_dtype : dtype for the softmax exp (jnp.bfloat16 recommended on
                v6e/v7x).  None = float32.
    """
    bs, seq, width = qkv.shape
    assert width % num_heads == 0
    chunk = width // num_heads          # per-head chunk = 3 * head_dim
    assert chunk % 3 == 0
    head_dim = chunk // 3

    # The two PyTorch branches differ only in the softmax scale:
    #   use_sdpa=True  -> 1/sqrt(head_dim)            (SDPA default)
    #   use_sdpa=False -> 1/sqrt(width // num_heads)  (= 1/sqrt(3*head_dim))
    scale = (1.0 / math.sqrt(head_dim)) if use_sdpa else (1.0 / math.sqrt(chunk))

    # One XLA column permute -> head-major, lane-aligned Q/K/V slabs of shape
    # (bs, H, seq, D).  The softmax scale is folded into q here (fused into
    # the same copy, free).
    x = qkv.reshape(bs, seq, num_heads, 3, head_dim)
    q = jnp.transpose(x[..., 0, :], (0, 2, 1, 3)) * scale
    k = jnp.transpose(x[..., 1, :], (0, 2, 1, 3))
    v = jnp.transpose(x[..., 2, :], (0, 2, 1, 3))

    itemsize = jnp.dtype(qkv.dtype).itemsize
    hb, tk, vmem_limit = _select_tiles(bs, num_heads, seq, head_dim, itemsize,
                                       heads_per_block, kv_block)
    n_groups = num_heads // hb
    n_kv = seq // tk

    kernel = functools.partial(_attention_group_kernel,
                               mxu_dtype=mxu_dtype, exp_dtype=exp_dtype,
                               precision=precision)

    out = pl.pallas_call(
        kernel,
        out_shape=jax.ShapeDtypeStruct((bs, num_heads, seq, head_dim), qkv.dtype),
        grid_spec=pltpu.PrefetchScalarGridSpec(
            num_scalar_prefetch=0,
            grid=(bs, n_groups, n_kv),
            in_specs=[
                # q: resident across the kv axis.
                pl.BlockSpec((None, hb, seq, head_dim),
                             lambda b, g, t: (b, g, 0, 0)),
                pl.BlockSpec((None, hb, tk, head_dim),
                             lambda b, g, t: (b, g, t, 0)),
                pl.BlockSpec((None, hb, tk, head_dim),
                             lambda b, g, t: (b, g, t, 0)),
            ],
            # Output block constant across the kv axis -> accumulator-resident.
            out_specs=pl.BlockSpec((None, hb, seq, head_dim),
                                   lambda b, g, t: (b, g, 0, 0)),
            scratch_shapes=[
                pltpu.VMEM((hb, seq, 1), jnp.float32),         # running max
                pltpu.VMEM((hb, seq, 1), jnp.float32),         # running denom
                pltpu.VMEM((hb, seq, head_dim), jnp.float32),  # running numerator
            ],
        ),
        compiler_params=pltpu.CompilerParams(
            dimension_semantics=("parallel", "parallel", "arbitrary"),
            vmem_limit_bytes=vmem_limit,
        ),
    )(q, k, v)

    # (bs, H, seq, D) -> (bs, seq, H*D); trailing-dim merge is layout-free.
    return jnp.transpose(out, (0, 2, 1, 3)).reshape(bs, seq, num_heads * head_dim)


def _reference(qkv, *, num_heads: int, use_sdpa: bool):
    """Pure-JAX reference mirroring the PyTorch module (f32-exact matmuls)."""
    bs, seq, width = qkv.shape
    chunk = width // num_heads
    head_dim = chunk // 3
    x = qkv.reshape(bs, seq, num_heads, chunk)
    q, k, v = x[..., :head_dim], x[..., head_dim:2 * head_dim], x[..., 2 * head_dim:]
    q = jnp.transpose(q, (0, 2, 1, 3))
    k = jnp.transpose(k, (0, 2, 1, 3))
    v = jnp.transpose(v, (0, 2, 1, 3))
    scale = (1.0 / math.sqrt(head_dim)) if use_sdpa else (1.0 / math.sqrt(chunk))
    w = jnp.einsum("bhmc,bhnc->bhmn", q, k * scale,
                   precision=lax.Precision.HIGHEST)
    w = jax.nn.softmax(w, axis=-1)
    out = jnp.einsum("bhmn,bhnc->bhmc", w, v, precision=lax.Precision.HIGHEST)
    return jnp.transpose(out, (0, 2, 1, 3)).reshape(bs, seq, num_heads * head_dim)


if __name__ == "__main__":
    k1, k2 = jax.random.split(jax.random.PRNGKey(0))
    ok = True

    # Inputs snapped to the bf16 grid so the check is insensitive to the MXU
    # pass-precision while remaining a real end-to-end correctness test.
    def _snap(a):
        return a.astype(jnp.bfloat16).astype(jnp.float32)

    # Case 1: small example (bs=2, seq=16, H=4, D=8 -> width=96), both torch
    # branches; single kv tile, all heads in one group per batch element.
    num_heads, head_dim, bs, seq = 4, 8, 2, 16
    width = num_heads * 3 * head_dim
    qkv1 = _snap(jax.random.normal(k1, (bs, seq, width), dtype=jnp.float32))
    for use_sdpa in (True, False):
        out = jax.block_until_ready(
            qkv_multihead_attention(qkv1, num_heads=num_heads, use_sdpa=use_sdpa))
        ref = _reference(qkv1, num_heads=num_heads, use_sdpa=use_sdpa)
        ok = ok and bool(jnp.allclose(out, ref, atol=5e-3, rtol=5e-3))

    # Case 2: exercise the KV-tiled online-softmax path
    # (bs=1, seq=256, 2 head groups x 2 kv tiles).
    num_heads, head_dim, bs, seq = 4, 8, 1, 256
    width = num_heads * 3 * head_dim
    qkv2 = _snap(jax.random.normal(k2, (bs, seq, width), dtype=jnp.float32))
    out2 = jax.block_until_ready(
        qkv_multihead_attention(qkv2, num_heads=num_heads, use_sdpa=True,
                                heads_per_block=2, kv_block=128))
    ref2 = _reference(qkv2, num_heads=num_heads, use_sdpa=True)
    ok = ok and bool(jnp.allclose(out2, ref2, atol=5e-3, rtol=5e-3))

    if ok:
        print("KERNEL_OK")
    else:
        raise SystemExit("mismatch vs reference")
</pallas_src>

<mosaic_0001>
module attributes {stable_mosaic.version = 11 : i64} {
  func.func @_attention_group_kernel(%arg0: i32, %arg1: i32, %arg2: i32, %arg3: memref<1x4x16x8xf32, #tpu.memory_space<vmem>>, %arg4: memref<1x4x16x8xf32, #tpu.memory_space<vmem>>, %arg5: memref<1x4x16x8xf32, #tpu.memory_space<vmem>>, %arg6: memref<1x4x16x8xf32, #tpu.memory_space<vmem>>, %arg7: memref<4x16x1xf32, #tpu.memory_space<vmem>>, %arg8: memref<4x16x1xf32, #tpu.memory_space<vmem>>, %arg9: memref<4x16x8xf32, #tpu.memory_space<vmem>>) attributes {dimension_semantics = [#tpu.dimension_semantics<parallel>, #tpu.dimension_semantics<parallel>, #tpu.dimension_semantics<arbitrary>], iteration_bounds = array<i64: 2, 1, 1>, scalar_prefetch = 0 : i64, scratch_operands = 3 : i64, tpu.core_type = #tpu.core_type<tc>, window_params = [{transform_indices = @transform_0, window_bounds = array<i64: 1, 4, 16, 8>}, {transform_indices = @transform_1, window_bounds = array<i64: 1, 4, 16, 8>}, {transform_indices = @transform_2, window_bounds = array<i64: 1, 4, 16, 8>}, {transform_indices = @transform_3, window_bounds = array<i64: 1, 4, 16, 8>}]} {
    %c0_i32 = arith.constant 0 : i32
    %0 = arith.cmpi eq, %arg2, %c0_i32 : i32
    %1 = arith.extui %0 : i1 to i32
    %c0_i32_0 = arith.constant 0 : i32
    %2 = arith.cmpi ne, %1, %c0_i32_0 : i32
    scf.if %2 {
      %cst_35 = arith.constant 0xFF800000 : f32
      %35 = vector.broadcast %cst_35 : f32 to vector<4x16x1xf32>
      %c0_36 = arith.constant 0 : index
      %c0_37 = arith.constant 0 : index
      %c0_38 = arith.constant 0 : index
      %36 = vector.load %arg7[%c0_36, %c0_37, %c0_38] : memref<4x16x1xf32, #tpu.memory_space<vmem>>, vector<4x16x1xf32>
      tpu.vector_store %arg7[%c0_36, %c0_37, %c0_38], %35 {strides = array<i32>} : memref<4x16x1xf32, #tpu.memory_space<vmem>>, vector<4x16x1xf32>,
      %cst_39 = arith.constant 0.000000e+00 : f32
      %37 = vector.broadcast %cst_39 : f32 to vector<4x16x1xf32>
      %c0_40 = arith.constant 0 : index
      %c0_41 = arith.constant 0 : index
      %c0_42 = arith.constant 0 : index
      %38 = vector.load %arg8[%c0_40, %c0_41, %c0_42] : memref<4x16x1xf32, #tpu.memory_space<vmem>>, vector<4x16x1xf32>
      tpu.vector_store %arg8[%c0_40, %c0_41, %c0_42], %37 {strides = array<i32>} : memref<4x16x1xf32, #tpu.memory_space<vmem>>, vector<4x16x1xf32>,
      %cst_43 = arith.constant 0.000000e+00 : f32
      %39 = vector.broadcast %cst_43 : f32 to vector<4x16x8xf32>
      %c0_44 = arith.constant 0 : index
      %c0_45 = arith.constant 0 : index
      %c0_46 = arith.constant 0 : index
      %40 = vector.load %arg9[%c0_44, %c0_45, %c0_46] : memref<4x16x8xf32, #tpu.memory_space<vmem>>, vector<4x16x8xf32>
      tpu.vector_store %arg9[%c0_44, %c0_45, %c0_46], %39 {strides = array<i32>} : memref<4x16x8xf32, #tpu.memory_space<vmem>>, vector<4x16x8xf32>,
    } else {
    }
    %c0 = arith.constant 0 : index
    %c0_1 = arith.constant 0 : index
    %c0_2 = arith.constant 0 : index
    %c0_3 = arith.constant 0 : index
    %3 = vector.load %arg3[%c0, %c0_1, %c0_2, %c0_3] : memref<1x4x16x8xf32, #tpu.memory_space<vmem>>, vector<1x4x16x8xf32>
    %4 = vector.shape_cast %3 : vector<1x4x16x8xf32> to vector<4x16x8xf32>
    %c0_4 = arith.constant 0 : index
    %c0_5 = arith.constant 0 : index
    %c0_6 = arith.constant 0 : index
    %c0_7 = arith.constant 0 : index
    %5 = vector.load %arg4[%c0_4, %c0_5, %c0_6, %c0_7] : memref<1x4x16x8xf32, #tpu.memory_space<vmem>>, vector<1x4x16x8xf32>
    %6 = vector.shape_cast %5 : vector<1x4x16x8xf32> to vector<4x16x8xf32>
    %c0_8 = arith.constant 0 : index
    %c0_9 = arith.constant 0 : index
    %c0_10 = arith.constant 0 : index
    %c0_11 = arith.constant 0 : index
    %7 = vector.load %arg5[%c0_8, %c0_9, %c0_10, %c0_11] : memref<1x4x16x8xf32, #tpu.memory_space<vmem>>, vector<1x4x16x8xf32>
    %8 = vector.shape_cast %7 : vector<1x4x16x8xf32> to vector<4x16x8xf32>
    "tpu.trace_start"() <{level = 10 : i32, message = "hqd,hkd->hqk"}> : () -> ()
    %cst = arith.constant dense<0.000000e+00> : vector<4x16x16xf32>
    %9 = tpu.matmul %4, %6, %cst {dimension_numbers = #tpu.dot_dimension_numbers<[2], [2], [1], [1], [0, 0, 0, 1, 1, 1], [0], [0]>, precision = #tpu.contract_precision<fp32>} : vector<4x16x8xf32>, vector<4x16x8xf32>, vector<4x16x16xf32> -> vector<4x16x16xf32>
    "tpu.trace_stop"() : () -> ()
    %c0_12 = arith.constant 0 : index
    %c0_13 = arith.constant 0 : index
    %c0_14 = arith.constant 0 : index
    %10 = vector.load %arg7[%c0_12, %c0_13, %c0_14] : memref<4x16x1xf32, #tpu.memory_space<vmem>>, vector<4x16x1xf32>
    %cst_15 = arith.constant dense<0xFF800000> : vector<4x16xf32>
    %11 = vector.multi_reduction <maximumf>, %9, %cst_15 [2] : vector<4x16x16xf32> to vector<4x16xf32>
    %12 = vector.shape_cast %11 : vector<4x16xf32> to vector<4x16x1xf32>
    %13 = arith.maximumf %10, %12 : vector<4x16x1xf32>
    %14 = arith.subf %10, %13 : vector<4x16x1xf32>
    %15 = math.exp %14 : vector<4x16x1xf32>
    %16 = vector.broadcast %13 : vector<4x16x1xf32> to vector<4x16x16xf32>
    %17 = arith.subf %9, %16 : vector<4x16x16xf32>
    %18 = math.exp %17 : vector<4x16x16xf32>
    %cst_16 = arith.constant dense<0.000000e+00> : vector<4x16xf32>
    %19 = vector.multi_reduction <add>, %18, %cst_16 [2] : vector<4x16x16xf32> to vector<4x16xf32>
    %20 = vector.shape_cast %19 : vector<4x16xf32> to vector<4x16x1xf32>
    %c0_17 = arith.constant 0 : index
    %c0_18 = arith.constant 0 : index
    %c0_19 = arith.constant 0 : index
    %21 = vector.load %arg8[%c0_17, %c0_18, %c0_19] : memref<4x16x1xf32, #tpu.memory_space<vmem>>, vector<4x16x1xf32>
    %22 = arith.mulf %15, %21 : vector<4x16x1xf32>
    %23 = arith.addf %22, %20 : vector<4x16x1xf32>
    %c0_20 = arith.constant 0 : index
    %c0_21 = arith.constant 0 : index
    %c0_22 = arith.constant 0 : index
    %24 = vector.load %arg8[%c0_20, %c0_21, %c0_22] : memref<4x16x1xf32, #tpu.memory_space<vmem>>, vector<4x16x1xf32>
    tpu.vector_store %arg8[%c0_20, %c0_21, %c0_22], %23 {strides = array<i32>} : memref<4x16x1xf32, #tpu.memory_space<vmem>>, vector<4x16x1xf32>,
    "tpu.trace_start"() <{level = 10 : i32, message = "hqk,hkd->hqd"}> : () -> ()
    %cst_23 = arith.constant dense<0.000000e+00> : vector<4x16x8xf32>
    %25 = tpu.matmul %18, %8, %cst_23 {dimension_numbers = #tpu.dot_dimension_numbers<[2], [1], [1], [2], [0, 0, 0, 1, 1, 2], [0], [0]>, precision = #tpu.contract_precision<fp32>} : vector<4x16x16xf32>, vector<4x16x8xf32>, vector<4x16x8xf32> -> vector<4x16x8xf32>
    "tpu.trace_stop"() : () -> ()
    %c0_24 = arith.constant 0 : index
    %c0_25 = arith.constant 0 : index
    %c0_26 = arith.constant 0 : index
    %26 = vector.load %arg9[%c0_24, %c0_25, %c0_26] : memref<4x16x8xf32, #tpu.memory_space<vmem>>, vector<4x16x8xf32>
    %27 = vector.broadcast %15 : vector<4x16x1xf32> to vector<4x16x8xf32>
    %28 = arith.mulf %27, %26 : vector<4x16x8xf32>
    %29 = arith.addf %28, %25 : vector<4x16x8xf32>
    %c0_27 = arith.constant 0 : index
    %c0_28 = arith.constant 0 : index
    %c0_29 = arith.constant 0 : index
    %30 = vector.load %arg9[%c0_27, %c0_28, %c0_29] : memref<4x16x8xf32, #tpu.memory_space<vmem>>, vector<4x16x8xf32>
    tpu.vector_store %arg9[%c0_27, %c0_28, %c0_29], %29 {strides = array<i32>} : memref<4x16x8xf32, #tpu.memory_space<vmem>>, vector<4x16x8xf32>,
    %c0_30 = arith.constant 0 : index
    %c0_31 = arith.constant 0 : index
    %c0_32 = arith.constant 0 : index
    %31 = vector.load %arg7[%c0_30, %c0_31, %c0_32] : memref<4x16x1xf32, #tpu.memory_space<vmem>>, vector<4x16x1xf32>
    tpu.vector_store %arg7[%c0_30, %c0_31, %c0_32], %13 {strides = array<i32>} : memref<4x16x1xf32, #tpu.memory_space<vmem>>, vector<4x16x1xf32>,
    %c0_i32_33 = arith.constant 0 : i32
    %32 = arith.cmpi eq, %arg2, %c0_i32_33 : i32
    %33 = arith.extui %32 : i1 to i32
    %c0_i32_34 = arith.constant 0 : i32
    %34 = arith.cmpi ne, %33, %c0_i32_34 : i32
    scf.if %34 {
      %c0_35 = arith.constant 0 : index
      %c0_36 = arith.constant 0 : index
      %c0_37 = arith.constant 0 : index
      %35 = vector.load %arg8[%c0_35, %c0_36, %c0_37] : memref<4x16x1xf32, #tpu.memory_space<vmem>>, vector<4x16x1xf32>
      %36 = tpu.reciprocal %35 {approx = true} : vector<4x16x1xf32> -> vector<4x16x1xf32>
      %37 = arith.mulf %35, %36 : vector<4x16x1xf32>
      %cst_38 = arith.constant 2.000000e+00 : f32
      %38 = vector.broadcast %cst_38 : f32 to vector<4x16x1xf32>
      %39 = arith.subf %38, %37 : vector<4x16x1xf32>
      %40 = arith.mulf %36, %39 : vector<4x16x1xf32>
      %c0_39 = arith.constant 0 : index
      %c0_40 = arith.constant 0 : index
      %c0_41 = arith.constant 0 : index
      %41 = vector.load %arg9[%c0_39, %c0_40, %c0_41] : memref<4x16x8xf32, #tpu.memory_space<vmem>>, vector<4x16x8xf32>
      %42 = vector.broadcast %40 : vector<4x16x1xf32> to vector<4x16x8xf32>
      %43 = arith.mulf %41, %42 : vector<4x16x8xf32>
      %c0_42 = arith.constant 0 : index
      %c0_43 = arith.constant 0 : index
      %c0_44 = arith.constant 0 : index
      %c0_45 = arith.constant 0 : index
      %44 = vector.load %arg6[%c0_42, %c0_43, %c0_44, %c0_45] : memref<1x4x16x8xf32, #tpu.memory_space<vmem>>, vector<1x4x16x8xf32>
      %45 = vector.shape_cast %44 : vector<1x4x16x8xf32> to vector<4x16x8xf32>
      %46 = vector.shape_cast %43 : vector<4x16x8xf32> to vector<1x4x16x8xf32>
      tpu.vector_store %arg6[%c0_42, %c0_43, %c0_44, %c0_45], %46 {strides = array<i32>} : memref<1x4x16x8xf32, #tpu.memory_space<vmem>>, vector<1x4x16x8xf32>,
    } else {
    }
    return
  }
  func.func @transform_0(%arg0: i32, %arg1: i32, %arg2: i32) -> (i32, i32, i32, i32) {
    %c0_i32 = arith.constant 0 : i32
    %c0_i32_0 = arith.constant 0 : i32
    %c0_i32_1 = arith.constant 0 : i32
    return %arg0, %arg1, %c0_i32, %c0_i32_0 : i32, i32, i32, i32
  }
  func.func @transform_1(%arg0: i32, %arg1: i32, %arg2: i32) -> (i32, i32, i32, i32) {
    %c0_i32 = arith.constant 0 : i32
    %c0_i32_0 = arith.constant 0 : i32
    return %arg0, %arg1, %arg2, %c0_i32 : i32, i32, i32, i32
  }
  func.func @transform_2(%arg0: i32, %arg1: i32, %arg2: i32) -> (i32, i32, i32, i32) {
    %c0_i32 = arith.constant 0 : i32
    %c0_i32_0 = arith.constant 0 : i32
    return %arg0, %arg1, %arg2, %c0_i32 : i32, i32, i32, i32
  }
  func.func @transform_3(%arg0: i32, %arg1: i32, %arg2: i32) -> (i32, i32, i32, i32) {
    %c0_i32 = arith.constant 0 : i32
    %c0_i32_0 = arith.constant 0 : i32
    %c0_i32_1 = arith.constant 0 : i32
    return %arg0, %arg1, %c0_i32, %c0_i32_0 : i32, i32, i32, i32
  }
}

</mosaic_0001>

<bundles_post_ra>
// kernel: tpu_custom_call.1
= control target key start
LH: loop header
LB: loop body
LE: loop exit
PB: predicated region body
PF: predicated region fallthrough
CT: control target
= control target key end

     0   :  { %s5666_s12 = smov 0   ;;  %s5668_s13 = smov 0   ;;  %s6304_s0 = inlined_call_operand.vmem [shape: f32[2,4,16,8], index: 0, kind: input, shape index: {}]   ;;  %s6305_s1 = inlined_call_operand.vmem [shape: f32[2,4,16,8], index: 1, kind: input, shape index: {}]   ;;  %s6306_s2 = inlined_call_operand.vmem [shape: f32[2,4,16,8], index: 2, kind: input, shape index: {}]   ;;  %s6307_s3 = inlined_call_operand.vmem [shape: f32[2,4,16,8], index: 3, kind: output, shape index: {}]  }
   0x1   :  { %s5670_s14 = smov 0  }
   0x2 LB: > { %s32_s15 = sadd.s32 1, %s5637_s13  ;;  %p4999_p0 = scmp.ge.s32.totalorder %s5641_s14, 1  ;;  %s5641_s14 = sphi %s5670_s14, %s13_s14   ;;  %s5637_s13 = sphi %s5668_s13, %s6309_s13   ;;  %s5633_s12 = sphi %s5666_s12, %s6308_s12  }
   0x3   : > { %p34_p1 = scmp.ge.s32.totalorder %s32_s15, 2  ;;  %p216_p2 = scmp.lt.s32.totalorder %s5641_s14, 3 }
   0x5   : > { %s6311_s15 = smov (%p34_p1, %s32_s15), 0  ;;  %p217_p3 = pnand %p4999_p0, %p216_p2 }
   0x6   : > { %p279_p4 = scmp.lt.s32.totalorder (!%p217_p3), %s5633_s12, 1 }
   0x7   : > { %220 = sbr.rel (%p217_p3) target bundleno = 903 (0x387), region = 32 }
   0xc   : > { %s6313_s12 = smov (!%p279_p4, %s5633_s12), 1  ;;  %vm353_vm0 = vcmask 64512   ;;  %vm336_vm1 = vcmask 7168   ;;  %vm2451_vm2 = vcmask 130048  }
   0xd   : > { %s5684_s16 = sshll.u32 %s6313_s12, 6 }
   0xe   : > { %s5690_s19 = scalar_lea.vmem %s6305_s1, %s5684_s16  ;;  %s5696_s22 = scalar_lea.vmem %s6304_s0, %s5684_s16 }
   0xf   : > { %v371_v0 = vld [vmem:[%s5690_s19 + $0x8] sm:$0xff]  ;;  %v370_v1 = vld [vmem:[%s5690_s19] sm:$0xff]  ;;  %v364_v19 = vld [vmem:[%s5696_s22 + $0x10] sm:$0xff]  ;;  %s5971_s25 = scalar_lea.vmem %s6306_s2, %s5684_s16  ;;  %s6275_s28 = scalar_lea.vmem %s6307_s3, %s5684_s16 }
  0x10   : > { %v362_v2 = vld [vmem:[%s5696_s22] sm:$0xff]  ;;  %v397_v3 = vsel %vm353_vm0, %v371_v0, 0  ;;  %v394_v4 = vsel %vm353_vm0, %v370_v1, 0  ;;  %v363_v6 = vld [vmem:[%s5696_s22 + $0x8] sm:$0xff]  ;;  %v373_v24 = vld [vmem:[%s5690_s19 + $0x18] sm:$0xff]  ;;  %v902_v26 = vsel %vm353_vm0, %v364_v19, 0 }
  0x11   : > { %v388_v5 = vsel %vm353_vm0, %v362_v2, 0  ;;  %v5705_v7 = vand.u32 4294901760, %v397_v3  ;;  %v5707_v8 = vand.u32 4294901760, %v394_v4  ;;  %v391_v10 = vsel %vm353_vm0, %v363_v6, 0  ;;  %v365_v32 = vld [vmem:[%s5696_s22 + $0x18] sm:$0xff]  ;;  %v372_v33 = vld [vmem:[%s5690_s19 + $0x10] sm:$0xff] }
  0x12   : > { %v5709_v9 = vand.u32 4294901760, %v388_v5  ;;  %v5712_v11 = vand.u32 4294901760, %v391_v10  ;;  %v911_v31 = vsel %vm353_vm0, %v373_v24, 0  ;;  %v5729_v34 = vand.u32 4294901760, %v902_v26  ;;  %v366_v54 = vld [vmem:[%s5696_s22 + $0x20] sm:$0xff]  ;;  %v375_v55 = vld [vmem:[%s5690_s19 + $0x28] sm:$0xff] }
  0x13   : > { %5206 = vmatprep.subr.mxu0 %v5705_v7  ;;  %v516_v12 = vsub.f32 %v397_v3, %v5705_v7  ;;  %v523_v14 = vsub.f32 %v394_v4, %v5707_v8  ;;  %v5731_v35 = vand.u32 4294901760, %v911_v31  ;;  %v905_v36 = vsel %vm353_vm0, %v365_v32, 0  ;;  %v367_v60 = vld [vmem:[%s5696_s22 + $0x28] sm:$0xff]  ;;  %v374_v61 = vld [vmem:[%s5690_s19 + $0x20] sm:$0xff]  ;;  %v377_v19 = vld [vmem:[%s5690_s19 + $0x38] sm:$0xff] }
  0x14   : > { %v467_v13 = vsub.f32 %v388_v5, %v5709_v9  ;;  %5217 = vmatprep.mubr.f32.mxu1 %v5709_v9  ;;  %5207 = vmatpush3.xpose.msra.mxu0 %v5705_v7  ;;  %v477_v15 = vsub.f32 %v391_v10, %v5712_v11  ;;  %v908_v37 = vsel %vm353_vm0, %v372_v33, 0  ;;  %v5736_v38 = vsub.f32 %v902_v26, %v5729_v34  ;;  %v369_v24 = vld [vmem:[%s5696_s22 + $0x38] sm:$0xff] }
  0x15   : > { %5208 = vmatprep.subr.mxu0 %v5707_v8  ;;  %v517_v16 = vand.u32 4294901760, %v516_v12  ;;  %v524_v18 = vand.u32 4294901760, %v523_v14  ;;  %v5738_v39 = vand.u32 4294901760, %v905_v36  ;;  %v5741_v40 = vand.u32 4294901760, %v908_v37 }
  0x16   : > { %v468_v17 = vand.u32 4294901760, %v467_v13  ;;  %v478_v20 = vand.u32 4294901760, %v477_v15  ;;  %v1030_v41 = vsub.f32 %v911_v31, %v5731_v35  ;;  %v982_v42 = vand.u32 4294901760, %v5736_v38 }
  0x17   : > { %v518_v21 = vsub.f32 %v516_v12, %v517_v16  ;;  %v525_v23 = vsub.f32 %v523_v14, %v524_v18  ;;  %v5748_v43 = vsub.f32 %v905_v36, %v5738_v39  ;;  %v1037_v45 = vsub.f32 %v908_v37, %v5741_v40 }
  0x18   : > { %v469_v22 = vsub.f32 %v467_v13, %v468_v17  ;;  %5209 = vmatpush3.xpose.msra.mxu0 %v5707_v8  ;;  %v479_v25 = vsub.f32 %v477_v15, %v478_v20  ;;  %v1031_v44 = vand.u32 4294901760, %v1030_v41  ;;  %v983_v46 = vsub.f32 %v5736_v38, %v982_v42 }
  0x19   : > { %v519_v27 = vand.u32 4294901760, %v518_v21  ;;  %5220 = vmatprep.subr.mxu0 %v516_v12  ;;  %v526_v29 = vand.u32 4294901760, %v525_v23  ;;  %v992_v47 = vand.u32 4294901760, %v5748_v43  ;;  %v1038_v49 = vand.u32 4294901760, %v1037_v45 }
  0x1a   : > { %v470_v28 = vand.u32 4294901760, %v469_v22  ;;  %v480_v30 = vand.u32 4294901760, %v479_v25  ;;  %v1032_v48 = vsub.f32 %v1030_v41, %v1031_v44  ;;  %v984_v50 = vand.u32 4294901760, %v983_v46  ;;  %v376_v25 = vld [vmem:[%s5690_s19 + $0x30] sm:$0xff] }
  0x1b   : > { %5213 = vmatprep.subr.mxu1 %v519_v27  ;;  %v993_v51 = vsub.f32 %v5748_v43, %v992_v47  ;;  %v1039_v53 = vsub.f32 %v1037_v45, %v1038_v49  ;;  %v1416_v57 = vsel %vm353_vm0, %v366_v54, 0  ;;  %v1425_v59 = vsel %vm353_vm0, %v375_v55, 0 }
  0x1c   : > { %5210 = vmatprep.mubr.f32.mxu0 %v470_v28  ;;  %5214 = vmatpush3.xpose.msra.mxu1 %v519_v27  ;;  %v1033_v52 = vand.u32 4294901760, %v1032_v48  ;;  %v5778_v62 = vand.u32 4294901760, %v1416_v57  ;;  %v5780_v63 = vand.u32 4294901760, %v1425_v59  ;;  %v1419_v0 = vsel %vm353_vm0, %v367_v60, 0 }
  0x1d   : > { %5211 = vmatmul.mubr.f32.vlgmr.msra.gmra.mxu0 %v480_v30  ;;  %5215 = vmatprep.subr.mxu1 %v526_v29  ;;  %v994_v56 = vand.u32 4294901760, %v993_v51  ;;  %v1040_v58 = vand.u32 4294901760, %v1039_v53  ;;  %v1422_v1 = vsel %vm353_vm0, %v374_v61, 0  ;;  %v5789_v3 = vand.u32 4294901760, %v1419_v0 }
  0x1e   : > { %5221 = vmatpush3.xpose.msra.mxu0 %v516_v12  ;;  %5224 = vmatprep.mubr.f32.mxu0 %v467_v13  ;;  %v5787_v2 = vsub.f32 %v1416_v57, %v5778_v62  ;;  %v5792_v4 = vand.u32 4294901760, %v1422_v1  ;;  %v1544_v5 = vsub.f32 %v1425_v59, %v5780_v63  ;;  %v1939_v23 = vsel %vm353_vm0, %v377_v19, 0 }
  0x1f   : > { %5222 = vmatprep.subr.mxu0 %v523_v14  ;;  %v5836_v27 = vand.u32 4294901760, %v1939_v23  ;;  %v1933_v28 = vsel %vm353_vm0, %v369_v24, 0  ;;  %v5643_v48 = vmov -inf  }
  0x20   : > { %5216 = vmatpush3.xpose.msra.mxu1 %v526_v29  ;;  %v1496_v6 = vand.u32 4294901760, %v5787_v2  ;;  %v1936_v29 = vsel %vm353_vm0, %v376_v25, 0  ;;  %v5845_v31 = vand.u32 4294901760, %v1933_v28  ;;  %337 = vst.msk [vmem:[#allocation2] sm:$0xff] %vm336_vm1, %v5643_v48  ;;  %338 = vst.msk [vmem:[#allocation2 + $0x8] sm:$0xff] %vm336_vm1, %v5643_v48 }
  0x21   : > { %5227 = vmatprep.subr.mxu1 %v5705_v7  ;;  %v5848_v32 = vand.u32 4294901760, %v1936_v29  ;;  %v2058_v33 = vsub.f32 %v1939_v23, %v5836_v27  ;;  %339 = vst.msk [vmem:[#allocation2 + $0x10] sm:$0xff] %vm336_vm1, %v5643_v48  ;;  %340 = vst.msk [vmem:[#allocation2 + $0x18] sm:$0xff] %vm336_vm1, %v5643_v48 }
  0x22   : > { %5223 = vmatpush3.xpose.msra.mxu0 %v523_v14  ;;  %v1497_v10 = vsub.f32 %v5787_v2, %v1496_v6  ;;  %341 = vst.msk [vmem:[#allocation2 + $0x20] sm:$0xff] %vm336_vm1, %v5643_v48  ;;  %342 = vst.msk [vmem:[#allocation2 + $0x28] sm:$0xff] %vm336_vm1, %v5643_v48 }
  0x23   : > { %5234 = vmatprep.subr.mxu0 %v517_v16  ;;  %5218 = vmatmul.mubr.f32.vlgmr.msra.gmra.mxu1 %v5712_v11  ;;  %v2059_v36 = vand.u32 4294901760, %v2058_v33  ;;  %v2065_v37 = vsub.f32 %v1936_v29, %v5848_v32  ;;  %343 = vst.msk [vmem:[#allocation2 + $0x30] sm:$0xff] %vm336_vm1, %v5643_v48  ;;  %344 = vst.msk [vmem:[#allocation2 + $0x38] sm:$0xff] %vm336_vm1, %v5643_v48 }
  0x24   : > { %5228 = vmatpush3.xpose.msra.mxu1 %v5705_v7  ;;  %5231 = vmatprep.mubr.f32.mxu1 %v468_v17  ;;  %v1498_v14 = vand.u32 4294901760, %v1497_v10 }
  0x25   : > { %5225 = vmatmul.mubr.f32.vlgmr.msra.gmra.mxu0 %v477_v15  ;;  %5229 = vmatprep.subr.mxu1 %v5707_v8 }
  0x26   : > { %5235 = vmatpush3.xpose.msra.mxu0 %v517_v16  ;;  %5238 = vmatprep.mubr.f32.mxu0 %v5709_v9 }
  0x27   : > { %5236 = vmatprep.subr.mxu0 %v524_v18 }
  0x28   : > { %5230 = vmatpush3.xpose.msra.mxu1 %v5707_v8 }
  0x29   : > { %5241 = vmatprep.subr.mxu1 %v5705_v7 }
  0x2a   : > { %5237 = vmatpush3.xpose.msra.mxu0 %v524_v18  ;;  %v368_v18 = vld [vmem:[%s5696_s22 + $0x30] sm:$0xff] }
  0x2b   : > { %5248 = vmatprep.subr.mxu0 %v5731_v35  ;;  %5232 = vmatmul.mubr.f32.vlgmr.msra.gmra.mxu1 %v478_v20  ;;  %v1930_v21 = vsel %vm353_vm0, %v368_v18, 0  ;;  %v5644_v18 = vmov 0  }
  0x2c   : > { %5242 = vmatpush3.xpose.msra.mxu1 %v5705_v7  ;;  %5245 = vmatprep.mubr.f32.mxu1 %v5709_v9  ;;  %v5800_v7 = vsub.f32 %v1419_v0, %v5789_v3  ;;  %v1551_v9 = vsub.f32 %v1422_v1, %v5792_v4  ;;  %v5834_v26 = vand.u32 4294901760, %v1930_v21 }
  0x2d   : > { %5239 = vmatmul.mubr.f32.vlgmr.msra.gmra.mxu0 %v5712_v11  ;;  %5243 = vmatprep.subr.mxu1 %v5707_v8 }
  0x2e   : > { %5249 = vmatpush3.xpose.msra.mxu0 %v5731_v35  ;;  %5252 = vmatprep.mubr.f32.mxu0 %v984_v50  ;;  %v1552_v13 = vand.u32 4294901760, %v1551_v9  ;;  %v5843_v30 = vsub.f32 %v1930_v21, %v5834_v26 }
  0x2f   : > { %5250 = vmatprep.subr.mxu0 %v5741_v40  ;;  %5569 = vset.pattern.permute.xlu0 %v5644_v18 }
  0x30   : > { %5244 = vmatpush3.xpose.msra.mxu1 %v5707_v8  ;;  %v1545_v8 = vand.u32 4294901760, %v1544_v5  ;;  %v1553_v17 = vsub.f32 %v1551_v9, %v1552_v13  ;;  %5570 = vset.pattern.permute.xlu1 %v5644_v18 }
  0x31   : > { %5255 = vmatprep.subr.mxu1 %v1033_v52 }
  0x32   : > { %5251 = vmatpush3.xpose.msra.mxu0 %v5741_v40  ;;  %v1546_v12 = vsub.f32 %v1544_v5, %v1545_v8  ;;  %v1554_v22 = vand.u32 4294901760, %v1553_v17 }
  0x33   : > { %5262 = vmatprep.subr.mxu0 %v1030_v41  ;;  %5246 = vmatmul.mubr.f32.vlgmr.msra.gmra.mxu1 %v5712_v11  ;;  %v1506_v11 = vand.u32 4294901760, %v5800_v7 }
  0x34   : > { %5256 = vmatpush3.xpose.msra.mxu1 %v1033_v52  ;;  %5259 = vmatprep.mubr.f32.mxu1 %v5729_v34  ;;  %v1547_v16 = vand.u32 4294901760, %v1546_v12 }
  0x35   : > { %5253 = vmatmul.mubr.f32.vlgmr.msra.gmra.mxu0 %v994_v56  ;;  %5257 = vmatprep.subr.mxu1 %v1040_v58  ;;  %v1507_v15 = vsub.f32 %v5800_v7, %v1506_v11 }
  0x36   : > { %5263 = vmatpush3.xpose.msra.mxu0 %v1030_v41  ;;  %5266 = vmatprep.mubr.f32.mxu0 %v5736_v38  ;;  %v2066_v41 = vand.u32 4294901760, %v2065_v37 }
  0x37   : > { %5264 = vmatprep.subr.mxu0 %v1037_v45  ;;  %v1508_v20 = vand.u32 4294901760, %v1507_v15 }
  0x38   : > { %5258 = vmatpush3.xpose.msra.mxu1 %v1040_v58 }
  0x39   : > { %5269 = vmatprep.subr.mxu1 %v5731_v35 }
  0x3a   : > { %5265 = vmatpush3.xpose.msra.mxu0 %v1037_v45  ;;  %v2067_v45 = vsub.f32 %v2065_v37, %v2066_v41 }
  0x3b   : > { %5276 = vmatprep.subr.mxu0 %v1031_v44  ;;  %5260 = vmatmul.mubr.f32.vlgmr.msra.gmra.mxu1 %v5738_v39 }
  0x3c   : > { %5270 = vmatpush3.xpose.msra.mxu1 %v5731_v35  ;;  %5273 = vmatprep.mubr.f32.mxu1 %v982_v42 }
  0x3d   : > { %5267 = vmatmul.mubr.f32.vlgmr.msra.gmra.mxu0 %v5748_v43  ;;  %5271 = vmatprep.subr.mxu1 %v5741_v40 }
  0x3e   : > { %5277 = vmatpush3.xpose.msra.mxu0 %v1031_v44  ;;  %5280 = vmatprep.mubr.f32.mxu0 %v5729_v34 }
  0x3f   : > { %5278 = vmatprep.subr.mxu0 %v1038_v49 }
  0x40   : > { %5272 = vmatpush3.xpose.msra.mxu1 %v5741_v40 }
  0x41   : > { %5283 = vmatprep.subr.mxu1 %v5731_v35 }
  0x42   : > { %5279 = vmatpush3.xpose.msra.mxu0 %v1038_v49 }
  0x43   : > { %5290 = vmatprep.subr.mxu0 %v5780_v63  ;;  %5274 = vmatmul.mubr.f32.vlgmr.msra.gmra.mxu1 %v992_v47  ;;  %v2068_v47 = vand.u32 4294901760, %v2067_v45 }
  0x44   : > { %5284 = vmatpush3.xpose.msra.mxu1 %v5731_v35  ;;  %5287 = vmatprep.mubr.f32.mxu1 %v5729_v34  ;;  %v2010_v34 = vand.u32 4294901760, %v5843_v30  ;;  %v2019_v35 = vsub.f32 %v1933_v28, %v5845_v31 }
  0x45   : > { %5281 = vmatmul.mubr.f32.vlgmr.msra.gmra.mxu0 %v5738_v39  ;;  %5285 = vmatprep.subr.mxu1 %v5741_v40 }
  0x46   : > { %5291 = vmatpush3.xpose.msra.mxu0 %v5780_v63  ;;  %5294 = vmatprep.mubr.f32.mxu0 %v1498_v14  ;;  %v2011_v38 = vsub.f32 %v5843_v30, %v2010_v34 }
  0x47   : > { %5292 = vmatprep.subr.mxu0 %v5792_v4 }
  0x48   : > { %5286 = vmatpush3.xpose.msra.mxu1 %v5741_v40  ;;  %v2060_v40 = vsub.f32 %v2058_v33, %v2059_v36  ;;  %v2012_v42 = vand.u32 4294901760, %v2011_v38 }
  0x49   : > { %5297 = vmatprep.subr.mxu1 %v1547_v16 }
  0x4a   : > { %5293 = vmatpush3.xpose.msra.mxu0 %v5792_v4  ;;  %v2061_v44 = vand.u32 4294901760, %v2060_v40 }
  0x4b   : > { %5304 = vmatprep.subr.mxu0 %v1544_v5  ;;  %5288 = vmatmul.mubr.f32.vlgmr.msra.gmra.mxu1 %v5738_v39  ;;  %v2020_v39 = vand.u32 4294901760, %v2019_v35 }
  0x4c   : > { %5298 = vmatpush3.xpose.msra.mxu1 %v1547_v16  ;;  %5301 = vmatprep.mubr.f32.mxu1 %v5778_v62 }
  0x4d   : > { %5295 = vmatmul.mubr.f32.vlgmr.msra.gmra.mxu0 %v1508_v20  ;;  %5299 = vmatprep.subr.mxu1 %v1554_v22  ;;  %v2021_v43 = vsub.f32 %v2019_v35, %v2020_v39 }
  0x4e   : > { %5305 = vmatpush3.xpose.msra.mxu0 %v1544_v5  ;;  %5308 = vmatprep.mubr.f32.mxu0 %v5787_v2 }
  0x4f   : > { %5306 = vmatprep.subr.mxu0 %v1551_v9  ;;  %v2022_v46 = vand.u32 4294901760, %v2021_v43 }
  0x50   : > { %5300 = vmatpush3.xpose.msra.mxu1 %v1554_v22 }
  0x51   : > { %5311 = vmatprep.subr.mxu1 %v5780_v63 }
  0x52   : > { %5307 = vmatpush3.xpose.msra.mxu0 %v1551_v9 }
  0x53   : > { %5318 = vmatprep.subr.mxu0 %v1545_v8  ;;  %5302 = vmatmul.mubr.f32.vlgmr.msra.gmra.mxu1 %v5789_v3 }
  0x54   : > { %5312 = vmatpush3.xpose.msra.mxu1 %v5780_v63  ;;  %5315 = vmatprep.mubr.f32.mxu1 %v1496_v6 }
  0x55   : > { %5309 = vmatmul.mubr.f32.vlgmr.msra.gmra.mxu0 %v5800_v7  ;;  %5313 = vmatprep.subr.mxu1 %v5792_v4 }
  0x56   : > { %5319 = vmatpush3.xpose.msra.mxu0 %v1545_v8  ;;  %5322 = vmatprep.mubr.f32.mxu0 %v5778_v62 }
  0x57   : > { %5320 = vmatprep.subr.mxu0 %v1552_v13 }
  0x58   : > { %5314 = vmatpush3.xpose.msra.mxu1 %v5792_v4 }
  0x59   : > { %5325 = vmatprep.subr.mxu1 %v5780_v63 }
  0x5a   : > { %5321 = vmatpush3.xpose.msra.mxu0 %v1552_v13 }
  0x5b   : > { %5332 = vmatprep.subr.mxu0 %v5836_v27  ;;  %5316 = vmatmul.mubr.f32.vlgmr.msra.gmra.mxu1 %v1506_v11 }
  0x5c   : > { %5326 = vmatpush3.xpose.msra.mxu1 %v5780_v63  ;;  %5329 = vmatprep.mubr.f32.mxu1 %v5778_v62 }
  0x5d   : > { %5323 = vmatmul.mubr.f32.vlgmr.msra.gmra.mxu0 %v5789_v3  ;;  %5327 = vmatprep.subr.mxu1 %v5792_v4 }
  0x5e   : > { %5333 = vmatpush3.xpose.msra.mxu0 %v5836_v27  ;;  %5336 = vmatprep.mubr.f32.mxu0 %v2012_v42 }
  0x5f   : > { %5334 = vmatprep.subr.mxu0 %v5848_v32 }
  0x60   : > { %5328 = vmatpush3.xpose.msra.mxu1 %v5792_v4 }
  0x61   : > { %5339 = vmatprep.subr.mxu1 %v2061_v44 }
  0x62   : > { %5335 = vmatpush3.xpose.msra.mxu0 %v5848_v32 }
  0x63   : > { %5346 = vmatprep.subr.mxu0 %v2058_v33  ;;  %5330 = vmatmul.mubr.f32.vlgmr.msra.gmra.mxu1 %v5789_v3 }
  0x64   : > { %5340 = vmatpush3.xpose.msra.mxu1 %v2061_v44  ;;  %5343 = vmatprep.mubr.f32.mxu1 %v5834_v26 }
  0x65   : > { %5337 = vmatmul.mubr.f32.vlgmr.msra.gmra.mxu0 %v2022_v46  ;;  %5341 = vmatprep.subr.mxu1 %v2068_v47 }
  0x66   : > { %5347 = vmatpush3.xpose.msra.mxu0 %v2058_v33  ;;  %5350 = vmatprep.mubr.f32.mxu0 %v5843_v30 }
  0x67   : > { %5348 = vmatprep.subr.mxu0 %v2065_v37 }
  0x68   : > { %5342 = vmatpush3.xpose.msra.mxu1 %v2068_v47 }
  0x69   : > { %5353 = vmatprep.subr.mxu1 %v5836_v27 }
  0x6a   : > { %5349 = vmatpush3.xpose.msra.mxu0 %v2065_v37 }
  0x6b   : > { %5360 = vmatprep.subr.mxu0 %v2059_v36  ;;  %5344 = vmatmul.mubr.f32.vlgmr.msra.gmra.mxu1 %v5845_v31 }
  0x6c   : > { %5354 = vmatpush3.xpose.msra.mxu1 %v5836_v27  ;;  %5357 = vmatprep.mubr.f32.mxu1 %v2010_v34  ;;  %v5645_v34 = vmov 0.0  }
  0x6d   : > { %5351 = vmatmul.mubr.f32.vlgmr.msra.gmra.mxu0 %v2019_v35  ;;  %5355 = vmatprep.subr.mxu1 %v5848_v32  ;;  %345 = vst.msk [vmem:[#allocation3] sm:$0xff] %vm336_vm1, %v5645_v34  ;;  %346 = vst.msk [vmem:[#allocation3 + $0x8] sm:$0xff] %vm336_vm1, %v5645_v34 }
  0x6e   : > { %5361 = vmatpush3.xpose.msra.mxu0 %v2059_v36  ;;  %5364 = vmatprep.mubr.f32.mxu0 %v5834_v26  ;;  %347 = vst.msk [vmem:[#allocation3 + $0x10] sm:$0xff] %vm336_vm1, %v5645_v34  ;;  %348 = vst.msk [vmem:[#allocation3 + $0x18] sm:$0xff] %vm336_vm1, %v5645_v34 }
  0x6f   : > { %5362 = vmatprep.subr.mxu0 %v2066_v41  ;;  %349 = vst.msk [vmem:[#allocation3 + $0x20] sm:$0xff] %vm336_vm1, %v5645_v34  ;;  %350 = vst.msk [vmem:[#allocation3 + $0x28] sm:$0xff] %vm336_vm1, %v5645_v34 }
  0x70   : > { %5356 = vmatpush3.xpose.msra.mxu1 %v5848_v32  ;;  %351 = vst.msk [vmem:[#allocation3 + $0x30] sm:$0xff] %vm336_vm1, %v5645_v34  ;;  %352 = vst.msk [vmem:[#allocation3 + $0x38] sm:$0xff] %vm336_vm1, %v5645_v34 }
  0x71   : > { %5367 = vmatprep.subr.mxu1 %v5836_v27  ;;  %354 = vst.msk [vmem:[#allocation4] sm:$0xff] %vm353_vm0, %v5645_v34  ;;  %355 = vst.msk [vmem:[#allocation4 + $0x8] sm:$0xff] %vm353_vm0, %v5645_v34 }
  0x72   : > { %5363 = vmatpush3.xpose.msra.mxu0 %v2066_v41  ;;  %356 = vst.msk [vmem:[#allocation4 + $0x10] sm:$0xff] %vm353_vm0, %v5645_v34  ;;  %357 = vst.msk [vmem:[#allocation4 + $0x18] sm:$0xff] %vm353_vm0, %v5645_v34 }
  0x73   : > { %5358 = vmatmul.mubr.f32.vlgmr.msra.gmra.mxu1 %v2020_v39  ;;  %358 = vst.msk [vmem:[#allocation4 + $0x20] sm:$0xff] %vm353_vm0, %v5645_v34  ;;  %359 = vst.msk [vmem:[#allocation4 + $0x28] sm:$0xff] %vm353_vm0, %v5645_v34 }
  0x74   : > { %5368 = vmatpush3.xpose.msra.mxu1 %v5836_v27  ;;  %5371 = vmatprep.mubr.f32.mxu1 %v5834_v26  ;;  %360 = vst.msk [vmem:[#allocation4 + $0x30] sm:$0xff] %vm353_vm0, %v5645_v34  ;;  %361 = vst.msk [vmem:[#allocation4 + $0x38] sm:$0xff] %vm353_vm0, %v5645_v34 }
  0x75   : > { %5365 = vmatmul.mubr.f32.vlgmr.msra.gmra.mxu0 %v5845_v31  ;;  %5369 = vmatprep.subr.mxu1 %v5848_v32 }
  0x78   : > { %5370 = vmatpush3.xpose.msra.mxu1 %v5848_v32 }
  0x7b   : > { %5372 = vmatmul.mubr.f32.vlgmr.msra.gmra.mxu1 %v5845_v31 }
  0xdd   : > { %v5212_v49 = vpop.f32.mrf.mxu0 }
  0xdf   : > { %v472_v50 = vpop.f32.mrf.mxu0 }
  0xe3   : > { %v5219_v51 = vpop.f32.mrf.mxu1 }
  0xe4   : > { %v570_v57 = vadd.f32 %v5219_v51, %v5212_v49 }
  0xe5   : > { %v563_v52 = vpop.f32.mrf.mxu1  ;;  %v5226_v53 = vpop.f32.mrf.mxu0 }
  0xe6   : > { %v564_v54 = vadd.f32 %v563_v52, %v472_v50  ;;  %v653_v61 = vadd.f32 %v5226_v53, %v570_v57 }
  0xe7   : > { %v645_v55 = vpop.f32.mrf.mxu0 }
  0xe8   : > { %v646_v60 = vadd.f32 %v645_v55, %v564_v54 }
  0xeb   : > { %v5233_v56 = vpop.f32.mrf.mxu1 }
  0xec   : > { %v736_v0 = vadd.f32 %v5233_v56, %v653_v61 }
  0xed   : > { %v727_v58 = vpop.f32.mrf.mxu1  ;;  %v5240_v59 = vpop.f32.mrf.mxu0 }
  0xee   : > { %v728_v62 = vadd.f32 %v727_v58, %v646_v60  ;;  %v819_v4 = vadd.f32 %v5240_v59, %v736_v0 }
  0xef   : > { %v812_v63 = vpop.f32.mrf.mxu0 }
  0xf0   : > { %v813_v2 = vadd.f32 %v812_v63, %v728_v62 }
  0xf3   : > { %v5247_v1 = vpop.f32.mrf.mxu1 }
  0xf4   : > { %v5901_v7 = vadd.f32 %v5247_v1, %v819_v4 }
  0xf5   : > { %v891_v3 = vpop.f32.mrf.mxu1  ;;  %v5254_v6 = vpop.f32.mrf.mxu0 }
  0xf6   : > { %v5899_v5 = vadd.f32 %v891_v3, %v813_v2  ;;  %v2455_v11 = vsel %vm2451_vm2, %v5901_v7, -inf }
  0xf7   : > { %v986_v9 = vpop.f32.mrf.mxu0 }
  0xf8   : > { %v2452_v8 = vsel %vm2451_vm2, %v5899_v5, -inf }
  0xf9   : > { %2453 = vmax.xlane.f32.xlu0 %v2452_v8 }
  0xfb   : > { %v5261_v10 = vpop.f32.mrf.mxu1 }
  0xfc   : > { %v1084_v17 = vadd.f32 %v5261_v10, %v5254_v6 }
  0xfd   : > { %2456 = vmax.xlane.f32.xlu0 %v2455_v11  ;;  %v1077_v12 = vpop.f32.mrf.mxu1  ;;  %v5268_v13 = vpop.f32.mrf.mxu0 }
  0xfe   : > { %v1078_v14 = vadd.f32 %v1077_v12, %v986_v9  ;;  %v1167_v22 = vadd.f32 %v5268_v13, %v1084_v17 }
  0xff   : > { %v1159_v15 = vpop.f32.mrf.mxu0 }
 0x100   : > { %v1160_v21 = vadd.f32 %v1159_v15, %v1078_v14 }
 0x103   : > { %v5275_v16 = vpop.f32.mrf.mxu1 }
 0x104   : > { %v1250_v25 = vadd.f32 %v5275_v16, %v1167_v22 }
 0x105   : > { %v1241_v19 = vpop.f32.mrf.mxu1  ;;  %v5282_v20 = vpop.f32.mrf.mxu0 }
 0x106   : > { %v1242_v23 = vadd.f32 %v1241_v19, %v1160_v21  ;;  %v1333_v29 = vadd.f32 %v5282_v20, %v1250_v25  ;;  %v5947_v21 = vld [vmem:[#allocation2] sm:$0xff] }
 0x107   : > { %v1326_v24 = vpop.f32.mrf.mxu0 }
 0x108   : > { %v1327_v27 = vadd.f32 %v1326_v24, %v1242_v23  ;;  %v5952_v24 = vld [vmem:[#allocation2 + $0x8] sm:$0xff] }
 0x10b   : > { %v5289_v26 = vpop.f32.mrf.mxu1 }
 0x10c   : > { %v5909_v32 = vadd.f32 %v5289_v26, %v1333_v29  ;;  %v379_v29 = vld [vmem:[%s5971_s25 + $0x8] sm:$0xff] }
 0x10d   : > { %v1405_v28 = vpop.f32.mrf.mxu1  ;;  %v5296_v31 = vpop.f32.mrf.mxu0 }
 0x10e   : > { %v5907_v30 = vadd.f32 %v1405_v28, %v1327_v27  ;;  %v2461_v37 = vsel %vm2451_vm2, %v5909_v32, -inf }
 0x10f   : > { %v1500_v35 = vpop.f32.mrf.mxu0 }
 0x110   : > { %v2458_v33 = vsel %vm2451_vm2, %v5907_v30, -inf }
 0x111   : > { %2459 = vmax.xlane.f32.xlu1 %v2458_v33  ;;  %v378_v33 = vld [vmem:[%s5971_s25] sm:$0xff] }
 0x113   : > { %v5303_v36 = vpop.f32.mrf.mxu1 }
 0x114   : > { %v1598_v40 = vadd.f32 %v5303_v36, %v5296_v31  ;;  %v5974_v31 = vand.u32 4294901760, %v379_v29 }
 0x115   : > { %2462 = vmax.xlane.f32.xlu1 %v2461_v37  ;;  %v1591_v38 = vpop.f32.mrf.mxu1  ;;  %v5310_v39 = vpop.f32.mrf.mxu0 }
 0x116   : > { %v1592_v41 = vadd.f32 %v1591_v38, %v1500_v35  ;;  %v1681_v44 = vadd.f32 %v5310_v39, %v1598_v40  ;;  %v5978_v34 = vsub.f32 %v379_v29, %v5974_v31  ;;  %v5980_v35 = vand.u32 4294901760, %v378_v33  ;;  %5374 = vmatprep.subr.mxu0 %v5974_v31 }
 0x117   : > { %v1673_v42 = vpop.f32.mrf.mxu0  ;;  %5375 = vmatpush3.msra.mxu0 %v5974_v31 }
 0x118   : > { %v1674_v47 = vadd.f32 %v1673_v42, %v1592_v41  ;;  %v5985_v36 = vand.u32 4294901760, %v5978_v34  ;;  %v5988_v37 = vsub.f32 %v378_v33, %v5980_v35  ;;  %5376 = vmatprep.subr.mxu0 %v5980_v35 }
 0x119   : > { %5377 = vmatpush3.msra.mxu0 %v5980_v35 }
 0x11a   : > { %v2754_v38 = vsub.f32 %v5978_v34, %v5985_v36  ;;  %v5995_v39 = vand.u32 4294901760, %v5988_v37  ;;  %5388 = vmatprep.subr.mxu0 %v5978_v34 }
 0x11b   : > { %v5317_v43 = vpop.f32.mrf.mxu1 }
 0x11c   : > { %v1764_v48 = vadd.f32 %v5317_v43, %v1681_v44  ;;  %v2755_v40 = vand.u32 4294901760, %v2754_v38  ;;  %v2761_v41 = vsub.f32 %v5988_v37, %v5995_v39  ;;  %v6000_v43 = vld [vmem:[#allocation2 + $0x10] sm:$0xff] }
 0x11d   : > { %v1755_v45 = vpop.f32.mrf.mxu1  ;;  %v5324_v46 = vpop.f32.mrf.mxu0 }
 0x11e   : > { %v1756_v49 = vadd.f32 %v1755_v45, %v1674_v47  ;;  %v1847_v51 = vadd.f32 %v5324_v46, %v1764_v48  ;;  %5381 = vmatprep.subr.mxu1 %v2755_v40  ;;  %v2762_v42 = vand.u32 4294901760, %v2761_v41  ;;  %v6006_v46 = vld [vmem:[#allocation2 + $0x18] sm:$0xff] }
 0x11f   : > { %v1840_v50 = vpop.f32.mrf.mxu0  ;;  %5382 = vmatpush3.msra.mxu1 %v2755_v40 }
 0x120   : > { %v1841_v53 = vadd.f32 %v1840_v50, %v1756_v49  ;;  %5383 = vmatprep.subr.mxu1 %v2762_v42 }
 0x121   : > { %5384 = vmatpush3.msra.mxu1 %v2762_v42 }
 0x122   : > { %5395 = vmatprep.subr.mxu1 %v5974_v31 }
 0x123   : > { %v5331_v52 = vpop.f32.mrf.mxu1 }
 0x124   : > { %v5931_v54 = vadd.f32 %v5331_v52, %v1847_v51  ;;  %v6021_v51 = vld [vmem:[#allocation2 + $0x28] sm:$0xff] }
 0x125   : > { %v1919_v55 = vpop.f32.mrf.mxu1  ;;  %v5338_v58 = vpop.f32.mrf.mxu0 }
 0x126   : > { %v5933_v56 = vadd.f32 %v1919_v55, %v1841_v53  ;;  %v2467_v57 = vsel %vm2451_vm2, %v5931_v54, -inf  ;;  %v6023_v53 = vld [vmem:[#allocation2 + $0x20] sm:$0xff] }
 0x127   : > { %2468 = vmax.xlane.f32.xlu1 %v2467_v57  ;;  %v2014_v60 = vpop.f32.mrf.mxu0 }
 0x128   : > { %v2464_v59 = vsel %vm2451_vm2, %v5933_v56, -inf }
 0x129   : > { %2465 = vmax.xlane.f32.xlu0 %v2464_v59 }
 0x12b   : > { %v5345_v61 = vpop.f32.mrf.mxu1 }
 0x12c   : > { %v2112_v0 = vadd.f32 %v5345_v61, %v5338_v58  ;;  %v6041_v61 = vld [vmem:[#allocation2 + $0x38] sm:$0xff] }
 0x12d   : > { %v2105_v62 = vpop.f32.mrf.mxu1  ;;  %v5352_v63 = vpop.f32.mrf.mxu0 }
 0x12e   : > { %v2106_v1 = vadd.f32 %v2105_v62, %v2014_v60  ;;  %v2195_v4 = vadd.f32 %v5352_v63, %v2112_v0  ;;  %v6043_v63 = vld [vmem:[#allocation2 + $0x30] sm:$0xff] }
 0x12f   : > { %v2187_v2 = vpop.f32.mrf.mxu0 }
 0x130   : > { %v2188_v9 = vadd.f32 %v2187_v2, %v2106_v1 }
 0x133   : > { %v5359_v3 = vpop.f32.mrf.mxu1 }
 0x134   : > { %v2278_v10 = vadd.f32 %v5359_v3, %v2195_v4 }
 0x135   : > { %v2269_v6 = vpop.f32.mrf.mxu1  ;;  %v5366_v8 = vpop.f32.mrf.mxu0 }
 0x136   : > { %v2270_v11 = vadd.f32 %v2269_v6, %v2188_v9  ;;  %v2361_v13 = vadd.f32 %v5366_v8, %v2278_v10 }
 0x137   : > { %v2354_v12 = vpop.f32.mrf.mxu0 }
 0x138   : > { %v2355_v15 = vadd.f32 %v2354_v12, %v2270_v11 }
 0x13b   : > { %v5373_v14 = vpop.f32.mrf.mxu1 }
 0x13c   : > { %v5939_v16 = vadd.f32 %v5373_v14, %v2361_v13  ;;  %v381_v13 = vld [vmem:[%s5971_s25 + $0x18] sm:$0xff] }
 0x13d   : > { %v2433_v17 = vpop.f32.mrf.mxu1  ;;  %v6064_v14 = vand.u32 4294901760, %v381_v13 }
 0x13e   : > { %v5941_v18 = vadd.f32 %v2433_v17, %v2355_v15  ;;  %v2473_v19 = vsel %vm2451_vm2, %v5939_v16, -inf  ;;  %v380_v17 = vld [vmem:[%s5971_s25 + $0x10] sm:$0xff] }
 0x13f   : > { %2474 = vmax.xlane.f32.xlu1 %v2473_v19 }
 0x140   : > { %v2470_v20 = vsel %vm2451_vm2, %v5941_v18, -inf }
 0x141   : > { %2471 = vmax.xlane.f32.xlu0 %v2470_v20 }
 0x182   : > { %v2454_v22 = vpop.xlane.xlu0 %2453 }
 0x183   : > { %v5950_v23 = vmax.f32 %v5947_v21, %v2454_v22 }
 0x185   : > { %v2484_v25 = vsub.f32 %v5947_v21, %v5950_v23  ;;  %4733 = vst.msk [vmem:[#allocation2] sm:$0xff] %vm336_vm1, %v5950_v23  ;;  %2510 = vperm.xlu0 %5569, %v5950_v23  }
 0x186   : > { %v2457_v26 = vpop.xlane.xlu0 %2456 }
 0x187   : > { %v5960_v27 = vmax.f32 %v5952_v24, %v2457_v26  ;;  %v6072_v26 = vand.u32 4294901760, %v380_v17 }
 0x189   : > { %v2485_v28 = vsub.f32 %v5952_v24, %v5960_v27  ;;  %4734 = vst.msk [vmem:[#allocation2 + $0x8] sm:$0xff] %vm336_vm1, %v5960_v27  ;;  %2515 = vperm.xlu1 %5570, %v5960_v27  }
 0x19a   : > { %v2460_v44 = vpop.xlane.xlu1 %2459 }
 0x19b   : > { %v6004_v45 = vmax.f32 %v6000_v43, %v2460_v44 }
 0x19d   : > { %v2486_v47 = vsub.f32 %v6000_v43, %v6004_v45  ;;  %4735 = vst.msk [vmem:[#allocation2 + $0x10] sm:$0xff] %vm336_vm1, %v6004_v45  ;;  %2520 = vperm.xlu1 %5570, %v6004_v45  }
 0x19e   : > { %v2463_v48 = vpop.xlane.xlu1 %2462 }
 0x19f   : > { %v6014_v49 = vmax.f32 %v6006_v46, %v2463_v48  ;;  %v2496_v24 = vmul.f32 1.442695, %v2486_v47 }
 0x1a1   : > { %v2487_v50 = vsub.f32 %v6006_v46, %v6014_v49  ;;  %4736 = vst.msk [vmem:[#allocation2 + $0x18] sm:$0xff] %vm336_vm1, %v6014_v49  ;;  %2525 = vperm.xlu1 %5570, %v6014_v49  }
 0x1a3   : > { %v2498_v21 = vmul.f32 1.442695, %v2487_v50 }
 0x1b0   : > { %v2469_v52 = vpop.xlane.xlu1 %2468 }
 0x1b1   : > { %v6026_v55 = vmax.f32 %v6021_v51, %v2469_v52  ;;  %v6081_v52 = vsub.f32 %v380_v17, %v6072_v26 }
 0x1b2   : > { %v2466_v57 = vpop.xlane.xlu0 %2465 }
 0x1b3   : > { %v2489_v58 = vsub.f32 %v6021_v51, %v6026_v55  ;;  %4738 = vst.msk [vmem:[#allocation2 + $0x28] sm:$0xff] %vm336_vm1, %v6026_v55  ;;  %v6033_v59 = vmax.f32 %v6023_v53, %v2466_v57 }
 0x1b5   : > { %v2488_v60 = vsub.f32 %v6023_v53, %v6033_v59  ;;  %4737 = vst.msk [vmem:[#allocation2 + $0x20] sm:$0xff] %vm336_vm1, %v6033_v59  ;;  %2530 = vperm.xlu1 %5570, %v6033_v59   ;;  %v2502_v43 = vmul.f32 1.442695, %v2489_v58 }
 0x1b9   : > { %2535 = vperm.xlu1 %5570, %v6026_v55  }
 0x1c8   : > { %v2475_v62 = vpop.xlane.xlu1 %2474 }
 0x1c9   : > { %v6046_v0 = vmax.f32 %v6041_v61, %v2475_v62 }
 0x1ca   : > { %v2472_v1 = vpop.xlane.xlu0 %2471 }
 0x1cb   : > { %v2491_v2 = vsub.f32 %v6041_v61, %v6046_v0  ;;  %4740 = vst.msk [vmem:[#allocation2 + $0x38] sm:$0xff] %vm336_vm1, %v6046_v0  ;;  %v6053_v3 = vmax.f32 %v6043_v63, %v2472_v1  ;;  %v2596_v61 = vld [vmem:[#allocation3] sm:$0xff] }
 0x1cd   : > { %v2490_v4 = vsub.f32 %v6043_v63, %v6053_v3  ;;  %4739 = vst.msk [vmem:[#allocation2 + $0x30] sm:$0xff] %vm336_vm1, %v6053_v3  ;;  %2540 = vperm.xlu1 %5570, %v6053_v3   ;;  %v2506_v47 = vmul.f32 1.442695, %v2491_v2  ;;  %v2597_v2 = vld [vmem:[#allocation3 + $0x8] sm:$0xff] }
 0x1cf   : > { %v2504_v46 = vmul.f32 1.442695, %v2490_v4 }
 0x1d1   : > { %2545 = vperm.xlu1 %5570, %v6046_v0  }
 0x200   : > { %v2511_v6 = vpop.permute.xlu0 %2510 }
 0x201   : > { %v2548_v8 = vsub.f32 %v5899_v5, %v2511_v6  ;;  %v6070_v5 = vsub.f32 %v381_v13, %v6064_v14 }
 0x203   : > { %v2556_v9 = vmul.f32 1.442695, %v2548_v8  ;;  %v6078_v48 = vand.u32 4294901760, %v6070_v5 }
 0x204   : > { %v2516_v10 = vpop.permute.xlu1 %2515 }
 0x205   : > { %5571 = vpow2.f32 %v2556_v9  ;;  %v2549_v11 = vsub.f32 %v5901_v7, %v2516_v10  ;;  %v3262_v10 = vsub.f32 %v6070_v5, %v6078_v48 }
 0x207   : > { %v2558_v12 = vmul.f32 1.442695, %v2549_v11  ;;  %v6090_v11 = vand.u32 4294901760, %v6081_v52 }
 0x209   : > { %5573 = vpow2.f32 %v2558_v12  ;;  %v3269_v17 = vsub.f32 %v6081_v52, %v6090_v11 }
 0x212   : > { %v5572_v15 = vpop.eup %5571 }
 0x213   : > { %v2572_v19 = vsel %vm2451_vm2, %v5572_v15, 0.0  ;;  %v2630_v20 = vsel %vm2451_vm2, %v5572_v15, 0 }
 0x214   : > { %2573 = vadd.xlane.f32.xlu1 %v2572_v19  ;;  %v2702_v22 = vand.u32 4294901760, %v2630_v20  ;;  %v383_v19 = vld [vmem:[%s5971_s25 + $0x28] sm:$0xff] }
 0x216   : > { %v5574_v29 = vpop.eup %5573  ;;  %5385 = vmatprep.mubr.f32.mxu1 %v2702_v22  ;;  %v2703_v7 = vsub.f32 %v2630_v20, %v2702_v22 }
 0x217   : > { %v2575_v33 = vsel %vm2451_vm2, %v5574_v29, 0.0  ;;  %v2633_v38 = vsel %vm2451_vm2, %v5574_v29, 0 }
 0x218   : > { %2576 = vadd.xlane.f32.xlu0 %v2575_v33  ;;  %v2521_v40 = vpop.permute.xlu1 %2520  ;;  %v2712_v41 = vand.u32 4294901760, %v2633_v38  ;;  %v2704_v42 = vand.u32 4294901760, %v2703_v7 }
 0x219   : > { %v2550_v44 = vsub.f32 %v5907_v30, %v2521_v40 }
 0x21a   : > { %v2713_v57 = vsub.f32 %v2633_v38, %v2712_v41  ;;  %5386 = vmatmul.mubr.f32.vlgmr.msra.gmra.mxu1 %v2712_v41  ;;  %v2705_v62 = vsub.f32 %v2703_v7, %v2704_v42 }
 0x21b   : > { %v2560_v1 = vmul.f32 1.442695, %v2550_v44  ;;  %5396 = vmatpush3.msra.mxu1 %v5974_v31  ;;  %5399 = vmatprep.mubr.f32.mxu1 %v2704_v42 }
 0x21c   : > { %v2526_v6 = vpop.permute.xlu1 %2525  ;;  %5397 = vmatprep.subr.mxu1 %v5980_v35  ;;  %v2706_v8 = vand.u32 4294901760, %v2705_v62  ;;  %v2714_v9 = vand.u32 4294901760, %v2713_v57 }
 0x21d   : > { %5575 = vpow2.f32 %v2560_v1  ;;  %v2551_v30 = vsub.f32 %v5909_v32, %v2526_v6  ;;  %5398 = vmatpush3.msra.mxu1 %v5980_v35  ;;  %v3263_v32 = vand.u32 4294901760, %v3262_v10 }
 0x21e   : > { %5378 = vmatprep.mubr.f32.mxu0 %v2706_v8  ;;  %5400 = vmatmul.mubr.f32.vlgmr.msra.gmra.mxu1 %v2714_v9  ;;  %v2715_v12 = vsub.f32 %v2713_v57, %v2714_v9 }
 0x21f   : > { %v2562_v13 = vmul.f32 1.442695, %v2551_v30  ;;  %5409 = vmatprep.subr.mxu1 %v5974_v31  ;;  %5413 = vmatprep.mubr.f32.mxu1 %v2702_v22 }
 0x220   : > { %5410 = vmatpush3.msra.mxu1 %v5974_v31  ;;  %v2716_v15 = vand.u32 4294901760, %v2715_v12  ;;  %v3270_v31 = vand.u32 4294901760, %v3269_v17 }
 0x221   : > { %5577 = vpow2.f32 %v2562_v13  ;;  %5411 = vmatprep.subr.mxu1 %v5980_v35 }
 0x222   : > { %5412 = vmatpush3.msra.mxu1 %v5980_v35  ;;  %5379 = vmatmul.mubr.f32.vlgmr.msra.gmra.mxu0 %v2716_v15 }
 0x223   : > { %5414 = vmatmul.mubr.f32.vlgmr.msra.gmra.mxu1 %v2712_v41  ;;  %5389 = vmatpush3.msra.mxu0 %v5978_v34  ;;  %v6106_v34 = vand.u32 4294901760, %v383_v19 }
 0x224   : > { %5392 = vmatprep.mubr.f32.mxu0 %v2703_v7  ;;  %5390 = vmatprep.subr.mxu0 %v5988_v37 }
 0x225   : > { %5391 = vmatpush3.msra.mxu0 %v5988_v37  ;;  %5423 = vmatprep.subr.mxu1 %v3263_v32  ;;  %v382_v37 = vld [vmem:[%s5971_s25 + $0x20] sm:$0xff] }
 0x226   : > { %5393 = vmatmul.mubr.f32.vlgmr.msra.gmra.mxu0 %v2713_v57  ;;  %5402 = vmatprep.subr.mxu0 %v5985_v36 }
 0x227   : > { %5403 = vmatpush3.msra.mxu0 %v5985_v36  ;;  %5406 = vmatprep.mubr.f32.mxu0 %v2702_v22  ;;  %v6118_v22 = vand.u32 4294901760, %v382_v37 }
 0x228   : > { %5404 = vmatprep.subr.mxu0 %v5995_v39  ;;  %5424 = vmatpush3.msra.mxu1 %v3263_v32 }
 0x229   : > { %5405 = vmatpush3.msra.mxu0 %v5995_v39  ;;  %5425 = vmatprep.subr.mxu1 %v3270_v31  ;;  %v6116_v39 = vsub.f32 %v383_v19, %v6106_v34  ;;  %v6129_v1 = vsub.f32 %v382_v37, %v6118_v22 }
 0x22a   : > { %v5576_v35 = vpop.eup %5575  ;;  %5407 = vmatmul.mubr.f32.vlgmr.msra.gmra.mxu0 %v2712_v41  ;;  %5426 = vmatpush3.msra.mxu1 %v3270_v31 }
 0x22b   : > { %v2578_v20 = vsel %vm2451_vm2, %v5576_v35, 0.0  ;;  %v3138_v29 = vsel %vm2451_vm2, %v5576_v35, 0  ;;  %5437 = vmatprep.subr.mxu1 %v6064_v14  ;;  %5416 = vmatprep.subr.mxu0 %v6064_v14  ;;  %v6126_v62 = vand.u32 4294901760, %v6116_v39  ;;  %v6138_v15 = vand.u32 4294901760, %v6129_v1  ;;  %v385_v35 = vld [vmem:[%s5971_s25 + $0x38] sm:$0xff] }
 0x22c   : > { %2579 = vadd.xlane.f32.xlu0 %v2578_v20  ;;  %v3210_v36 = vand.u32 4294901760, %v3138_v29  ;;  %5417 = vmatpush3.msra.mxu0 %v6064_v14 }
 0x22d   : > { %5418 = vmatprep.subr.mxu0 %v6072_v26  ;;  %v3770_v13 = vsub.f32 %v6116_v39, %v6126_v62  ;;  %v3777_v19 = vsub.f32 %v6129_v1, %v6138_v15 }
 0x22e   : > { %v5578_v7 = vpop.eup %5577  ;;  %5427 = vmatprep.mubr.f32.mxu1 %v3210_v36  ;;  %v3211_v33 = vsub.f32 %v3138_v29, %v3210_v36  ;;  %5419 = vmatpush3.msra.mxu0 %v6072_v26 }
 0x22f   : > { %v2581_v38 = vsel %vm2451_vm2, %v5578_v7, 0.0  ;;  %v3141_v40 = vsel %vm2451_vm2, %v5578_v7, 0  ;;  %5430 = vmatprep.subr.mxu0 %v6070_v5 }
 0x230   : > { %v2531_v41 = vpop.permute.xlu1 %2530  ;;  %2582 = vadd.xlane.f32.xlu1 %v2581_v38  ;;  %v3220_v42 = vand.u32 4294901760, %v3141_v40  ;;  %v3212_v44 = vand.u32 4294901760, %v3211_v33 }
 0x231   : > { %v2552_v57 = vsub.f32 %v5933_v56, %v2531_v41 }
 0x232   : > { %v3221_v6 = vsub.f32 %v3141_v40, %v3220_v42  ;;  %5428 = vmatmul.mubr.f32.vlgmr.msra.gmra.mxu1 %v3220_v42  ;;  %v3213_v8 = vsub.f32 %v3211_v33, %v3212_v44 }
 0x233   : > { %v2564_v9 = vmul.f32 1.442695, %v2552_v57  ;;  %5438 = vmatpush3.msra.mxu1 %v6064_v14  ;;  %5441 = vmatprep.mubr.f32.mxu1 %v3212_v44 }
 0x234   : > { %v2536_v30 = vpop.permute.xlu1 %2535  ;;  %5439 = vmatprep.subr.mxu1 %v6072_v26  ;;  %v3214_v10 = vand.u32 4294901760, %v3213_v8  ;;  %v3222_v12 = vand.u32 4294901760, %v3221_v6 }
 0x235   : > { %5579 = vpow2.f32 %v2564_v9  ;;  %v2553_v56 = vsub.f32 %v5931_v54, %v2536_v30  ;;  %5440 = vmatpush3.msra.mxu1 %v6072_v26  ;;  %v3771_v54 = vand.u32 4294901760, %v3770_v13 }
 0x236   : > { %5420 = vmatprep.mubr.f32.mxu0 %v3214_v10  ;;  %5442 = vmatmul.mubr.f32.vlgmr.msra.gmra.mxu1 %v3222_v12  ;;  %v3223_v32 = vsub.f32 %v3221_v6, %v3222_v12 }
 0x237   : > { %v2566_v17 = vmul.f32 1.442695, %v2553_v56  ;;  %5451 = vmatprep.subr.mxu1 %v6064_v14  ;;  %5455 = vmatprep.mubr.f32.mxu1 %v3210_v36 }
 0x238   : > { %5452 = vmatpush3.msra.mxu1 %v6064_v14  ;;  %v3224_v31 = vand.u32 4294901760, %v3223_v32  ;;  %v3778_v14 = vand.u32 4294901760, %v3777_v19 }
 0x239   : > { %5581 = vpow2.f32 %v2566_v17  ;;  %5453 = vmatprep.subr.mxu1 %v6072_v26 }
 0x23a   : > { %5454 = vmatpush3.msra.mxu1 %v6072_v26  ;;  %5421 = vmatmul.mubr.f32.vlgmr.msra.gmra.mxu0 %v3224_v31 }
 0x23b   : > { %5456 = vmatmul.mubr.f32.vlgmr.msra.gmra.mxu1 %v3220_v42  ;;  %5431 = vmatpush3.msra.mxu0 %v6070_v5  ;;  %v6154_v5 = vand.u32 4294901760, %v385_v35 }
 0x23c   : > { %5434 = vmatprep.mubr.f32.mxu0 %v3211_v33  ;;  %5432 = vmatprep.subr.mxu0 %v6081_v52 }
 0x23d   : > { %5433 = vmatpush3.msra.mxu0 %v6081_v52  ;;  %5465 = vmatprep.subr.mxu1 %v3771_v54  ;;  %v384_v52 = vld [vmem:[%s5971_s25 + $0x30] sm:$0xff] }
 0x23e   : > { %5435 = vmatmul.mubr.f32.vlgmr.msra.gmra.mxu0 %v3221_v6  ;;  %5444 = vmatprep.subr.mxu0 %v6078_v48  ;;  %v6166_v29 = vand.u32 4294901760, %v384_v52 }
 0x23f   : > { %5445 = vmatpush3.msra.mxu0 %v6078_v48  ;;  %5448 = vmatprep.mubr.f32.mxu0 %v3210_v36 }
 0x240   : > { %5446 = vmatprep.subr.mxu0 %v6090_v11  ;;  %5466 = vmatpush3.msra.mxu1 %v3771_v54  ;;  %v6177_v6 = vsub.f32 %v384_v52, %v6166_v29 }
 0x241   : > { %5447 = vmatpush3.msra.mxu0 %v6090_v11  ;;  %5467 = vmatprep.subr.mxu1 %v3778_v14  ;;  %v6164_v11 = vsub.f32 %v385_v35, %v6154_v5  ;;  %v2494_v35 = vmul.f32 1.442695, %v2485_v28  ;;  %v2500_v28 = vmul.f32 1.442695, %v2488_v60 }
 0x242   : > { %v5580_v26 = vpop.eup %5579  ;;  %5449 = vmatmul.mubr.f32.vlgmr.msra.gmra.mxu0 %v3220_v42  ;;  %5468 = vmatpush3.msra.mxu1 %v3778_v14  ;;  %v6186_v32 = vand.u32 4294901760, %v6177_v6 }
 0x243   : > { %v2584_v37 = vsel %vm2451_vm2, %v5580_v26, 0.0  ;;  %v3646_v20 = vsel %vm2451_vm2, %v5580_v26, 0  ;;  %5479 = vmatprep.subr.mxu1 %v6106_v34  ;;  %5458 = vmatprep.subr.mxu0 %v6106_v34  ;;  %v6174_v57 = vand.u32 4294901760, %v6164_v11 }
 0x244   : > { %2585 = vadd.xlane.f32.xlu0 %v2584_v37  ;;  %v3718_v48 = vand.u32 4294901760, %v3646_v20  ;;  %5459 = vmatpush3.msra.mxu0 %v6106_v34  ;;  %v4285_v19 = vsub.f32 %v6177_v6, %v6186_v32  ;;  %v2492_v37 = vmul.f32 1.442695, %v2484_v25 }
 0x245   : > { %5460 = vmatprep.subr.mxu0 %v6118_v22  ;;  %v4278_v13 = vsub.f32 %v6164_v11, %v6174_v57 }
 0x246   : > { %v5582_v36 = vpop.eup %5581  ;;  %5469 = vmatprep.mubr.f32.mxu1 %v3718_v48  ;;  %v3719_v7 = vsub.f32 %v3646_v20, %v3718_v48  ;;  %5461 = vmatpush3.msra.mxu0 %v6118_v22 }
 0x247   : > { %v2587_v33 = vsel %vm2451_vm2, %v5582_v36, 0.0  ;;  %v3649_v38 = vsel %vm2451_vm2, %v5582_v36, 0  ;;  %5472 = vmatprep.subr.mxu0 %v6116_v39 }
 0x248   : > { %v2541_v40 = vpop.permute.xlu1 %2540  ;;  %2588 = vadd.xlane.f32.xlu1 %v2587_v33  ;;  %v3728_v41 = vand.u32 4294901760, %v3649_v38  ;;  %v3720_v42 = vand.u32 4294901760, %v3719_v7 }
 0x249   : > { %v2554_v44 = vsub.f32 %v5941_v18, %v2541_v40 }
 0x24a   : > { %v3729_v8 = vsub.f32 %v3649_v38, %v3728_v41  ;;  %5470 = vmatmul.mubr.f32.vlgmr.msra.gmra.mxu1 %v3728_v41  ;;  %v3721_v9 = vsub.f32 %v3719_v7, %v3720_v42  ;;  %v2598_v38 = vld [vmem:[#allocation3 + $0x10] sm:$0xff] }
 0x24b   : > { %v2568_v30 = vmul.f32 1.442695, %v2554_v44  ;;  %5480 = vmatpush3.msra.mxu1 %v6106_v34  ;;  %5483 = vmatprep.mubr.f32.mxu1 %v3720_v42  ;;  %v2599_v44 = vld [vmem:[#allocation3 + $0x18] sm:$0xff] }
 0x24c   : > { %v2546_v10 = vpop.permute.xlu1 %2545  ;;  %5481 = vmatprep.subr.mxu1 %v6118_v22  ;;  %v3722_v12 = vand.u32 4294901760, %v3721_v9  ;;  %v3730_v56 = vand.u32 4294901760, %v3729_v8 }
 0x24d   : > { %5583 = vpow2.f32 %v2568_v30  ;;  %v2555_v18 = vsub.f32 %v5939_v16, %v2546_v10  ;;  %5482 = vmatpush3.msra.mxu1 %v6118_v22  ;;  %v4279_v16 = vand.u32 4294901760, %v4278_v13 }
 0x24e   : > { %5462 = vmatprep.mubr.f32.mxu0 %v3722_v12  ;;  %5484 = vmatmul.mubr.f32.vlgmr.msra.gmra.mxu1 %v3730_v56  ;;  %v3731_v17 = vsub.f32 %v3729_v8, %v3730_v56 }
 0x24f   : > { %v2570_v31 = vmul.f32 1.442695, %v2555_v18  ;;  %5493 = vmatprep.subr.mxu1 %v6106_v34  ;;  %5497 = vmatprep.mubr.f32.mxu1 %v3718_v48 }
 0x250   : > { %5494 = vmatpush3.msra.mxu1 %v6106_v34  ;;  %v3732_v54 = vand.u32 4294901760, %v3731_v17  ;;  %v4286_v34 = vand.u32 4294901760, %v4285_v19 }
 0x251   : > { %5585 = vpow2.f32 %v2570_v31  ;;  %5495 = vmatprep.subr.mxu1 %v6118_v22 }
 0x252   : > { %5496 = vmatpush3.msra.mxu1 %v6118_v22  ;;  %5463 = vmatmul.mubr.f32.vlgmr.msra.gmra.mxu0 %v3732_v54  ;;  %5587 = vpow2.f32 %v2494_v35  ;;  %v2600_v54 = vld [vmem:[#allocation3 + $0x20] sm:$0xff] }
 0x253   : > { %5498 = vmatmul.mubr.f32.vlgmr.msra.gmra.mxu1 %v3728_v41  ;;  %5473 = vmatpush3.msra.mxu0 %v6116_v39  ;;  %5589 = vpow2.f32 %v2492_v37 }
 0x254   : > { %5476 = vmatprep.mubr.f32.mxu0 %v3719_v7  ;;  %5474 = vmatprep.subr.mxu0 %v6129_v1  ;;  %5591 = vpow2.f32 %v2496_v24 }
 0x255   : > { %5475 = vmatpush3.msra.mxu0 %v6129_v1  ;;  %5507 = vmatprep.subr.mxu1 %v4279_v16  ;;  %5593 = vpow2.f32 %v2498_v21 }
 0x256   : > { %5477 = vmatmul.mubr.f32.vlgmr.msra.gmra.mxu0 %v3729_v8  ;;  %5486 = vmatprep.subr.mxu0 %v6126_v62  ;;  %5595 = vpow2.f32 %v2500_v28 }
 0x257   : > { %5487 = vmatpush3.msra.mxu0 %v6126_v62  ;;  %5490 = vmatprep.mubr.f32.mxu0 %v3718_v48  ;;  %5597 = vpow2.f32 %v2502_v43 }
 0x258   : > { %5488 = vmatprep.subr.mxu0 %v6138_v15  ;;  %5508 = vmatpush3.msra.mxu1 %v4279_v16  ;;  %5599 = vpow2.f32 %v2504_v46 }
 0x259   : > { %5489 = vmatpush3.msra.mxu0 %v6138_v15  ;;  %5509 = vmatprep.subr.mxu1 %v4286_v34  ;;  %5601 = vpow2.f32 %v2506_v47 }
 0x25a   : > { %v5584_v39 = vpop.eup %5583  ;;  %5491 = vmatmul.mubr.f32.vlgmr.msra.gmra.mxu0 %v3728_v41  ;;  %5510 = vmatpush3.msra.mxu1 %v4286_v34 }
 0x25b   : > { %v2590_v22 = vsel %vm2451_vm2, %v5584_v39, 0.0  ;;  %v4154_v1 = vsel %vm2451_vm2, %v5584_v39, 0  ;;  %5521 = vmatprep.subr.mxu1 %v6154_v5  ;;  %5500 = vmatprep.subr.mxu0 %v6154_v5  ;;  %v2601_v39 = vld [vmem:[#allocation3 + $0x28] sm:$0xff] }
 0x25c   : > { %2591 = vadd.xlane.f32.xlu0 %v2590_v22  ;;  %v4226_v62 = vand.u32 4294901760, %v4154_v1  ;;  %5501 = vmatpush3.msra.mxu0 %v6154_v5 }
 0x25d   : > { %5502 = vmatprep.subr.mxu0 %v6166_v29 }
 0x25e   : > { %v5586_v14 = vpop.eup %5585  ;;  %5511 = vmatprep.mubr.f32.mxu1 %v4226_v62  ;;  %v4227_v15 = vsub.f32 %v4154_v1, %v4226_v62  ;;  %5503 = vmatpush3.msra.mxu0 %v6166_v29 }
 0x25f   : > { %v2593_v26 = vsel %vm2451_vm2, %v5586_v14, 0.0  ;;  %v4157_v52 = vsel %vm2451_vm2, %v5586_v14, 0  ;;  %5514 = vmatprep.subr.mxu0 %v6164_v11  ;;  %v5588_v49 = vpop.eup %5587 }
 0x260   : > { %2594 = vadd.xlane.f32.xlu1 %v2593_v26  ;;  %v4236_v20 = vand.u32 4294901760, %v4157_v52  ;;  %v4228_v48 = vand.u32 4294901760, %v4227_v15  ;;  %v5590_v50 = vpop.eup %5589  ;;  %v2605_v4 = vmul.f32 %v5588_v49, %v2597_v2 }
 0x261   : > { %v5592_v51 = vpop.eup %5591  ;;  %v2604_v63 = vmul.f32 %v5590_v50, %v2596_v61 }
 0x262   : > { %v4237_v36 = vsub.f32 %v4157_v52, %v4236_v20  ;;  %5512 = vmatmul.mubr.f32.vlgmr.msra.gmra.mxu1 %v4236_v20  ;;  %v4229_v7 = vsub.f32 %v4227_v15, %v4228_v48  ;;  %v5594_v53 = vpop.eup %5593  ;;  %v2606_v40 = vmul.f32 %v5592_v51, %v2598_v38 }
 0x263   : > { %5522 = vmatpush3.msra.mxu1 %v6154_v5  ;;  %5525 = vmatprep.mubr.f32.mxu1 %v4228_v48  ;;  %v5596_v55 = vpop.eup %5595  ;;  %v2607_v8 = vmul.f32 %v5594_v53, %v2599_v44  ;;  %v4662_v44 = vld [vmem:[#allocation4 + $0x8] sm:$0xff] }
 0x264   : > { %5523 = vmatprep.subr.mxu1 %v6166_v29  ;;  %v4230_v23 = vand.u32 4294901760, %v4229_v7  ;;  %v4238_v25 = vand.u32 4294901760, %v4237_v36  ;;  %v5598_v58 = vpop.eup %5597  ;;  %v2608_v16 = vmul.f32 %v5596_v55, %v2600_v54 }
 0x265   : > { %5524 = vmatpush3.msra.mxu1 %v6166_v29  ;;  %v6249_v59 = vpop.eup %5599 }
 0x266   : > { %5504 = vmatprep.mubr.f32.mxu0 %v4230_v23  ;;  %5526 = vmatmul.mubr.f32.vlgmr.msra.gmra.mxu1 %v4238_v25  ;;  %v4239_v27 = vsub.f32 %v4237_v36, %v4238_v25  ;;  %v6251_v60 = vpop.eup %5601  ;;  %v2602_v23 = vld [vmem:[#allocation3 + $0x30] sm:$0xff] }
 0x267   : > { %5535 = vmatprep.subr.mxu1 %v6154_v5  ;;  %5539 = vmatprep.mubr.f32.mxu1 %v4226_v62  ;;  %v2610_v43 = vmul.f32 %v6249_v59, %v2602_v23  ;;  %v4664_v23 = vld [vmem:[#allocation4 + $0x18] sm:$0xff] }
 0x268   : > { %5536 = vmatpush3.msra.mxu1 %v6154_v5  ;;  %v4240_v45 = vand.u32 4294901760, %v4239_v27 }
 0x269   : > { %5537 = vmatprep.subr.mxu1 %v6166_v29 }
 0x26a   : > { %5538 = vmatpush3.msra.mxu1 %v6166_v29  ;;  %5505 = vmatmul.mubr.f32.vlgmr.msra.gmra.mxu0 %v4240_v45 }
 0x26b   : > { %5540 = vmatmul.mubr.f32.vlgmr.msra.gmra.mxu1 %v4236_v20  ;;  %5515 = vmatpush3.msra.mxu0 %v6164_v11 }
 0x26c   : > { %5518 = vmatprep.mubr.f32.mxu0 %v4227_v15  ;;  %5516 = vmatprep.subr.mxu0 %v6177_v6 }
 0x26d   : > { %5517 = vmatpush3.msra.mxu0 %v6177_v6 }
 0x26e   : > { %5519 = vmatmul.mubr.f32.vlgmr.msra.gmra.mxu0 %v4237_v36  ;;  %5528 = vmatprep.subr.mxu0 %v6174_v57 }
 0x26f   : > { %5529 = vmatpush3.msra.mxu0 %v6174_v57  ;;  %5532 = vmatprep.mubr.f32.mxu0 %v4226_v62  ;;  %v2609_v62 = vmul.f32 %v5598_v58, %v2601_v39 }
 0x270   : > { %5530 = vmatprep.subr.mxu0 %v6186_v32 }
 0x271   : > { %5531 = vmatpush3.msra.mxu0 %v6186_v32  ;;  %4676 = vperm.xlu1 %5570, %v5588_v49   ;;  %v2603_v49 = vld [vmem:[#allocation3 + $0x38] sm:$0xff] }
 0x272   : > { %4671 = vperm.xlu0 %5569, %v5590_v50   ;;  %5533 = vmatmul.mubr.f32.vlgmr.msra.gmra.mxu0 %v4236_v20 }
 0x275   : > { %4681 = vperm.xlu1 %5570, %v5592_v51  }
 0x276   : > { %4686 = vperm.xlu0 %5569, %v5594_v53  }
 0x279   : > { %4691 = vperm.xlu1 %5570, %v5596_v55  }
 0x27a   : > { %4696 = vperm.xlu0 %5569, %v5598_v58  }
 0x27d   : > { %4701 = vperm.xlu1 %5570, %v6249_v59  }
 0x27e   : > { %4706 = vperm.xlu0 %5569, %v6251_v60  }
 0x29d   : > { %v2574_v0 = vpop.xlane.xlu1 %2573 }
 0x29e   : > { %v2612_v3 = vadd.f32 %v2604_v63, %v2574_v0  ;;  %v2611_v0 = vmul.f32 %v6251_v60, %v2603_v49 }
 0x2a0   : > { %2621 = vst.msk [vmem:[#allocation3] sm:$0xff] %vm336_vm1, %v2612_v3 }
 0x2a1   : > { %v2577_v5 = vpop.xlane.xlu0 %2576 }
 0x2a2   : > { %v2613_v11 = vadd.f32 %v2605_v4, %v2577_v5 }
 0x2a4   : > { %2622 = vst.msk [vmem:[#allocation3 + $0x8] sm:$0xff] %vm336_vm1, %v2613_v11 }
 0x2a7   : > { %v4744_v29 = vld [vmem:[#allocation3] sm:$0xff] }
 0x2a8   : > { %5603 = vrcp.f32 %v4744_v29 }
 0x2ab   : > { %v4745_v33 = vld [vmem:[#allocation3 + $0x8] sm:$0xff] }
 0x2ac   : > { %5605 = vrcp.f32 %v4745_v33 }
 0x2b5   : > { %v5604_v41 = vpop.eup %5603  ;;  %v2580_v42 = vpop.xlane.xlu0 %2579 }
 0x2b6   : > { %v2614_v57 = vadd.f32 %v2606_v40, %v2580_v42  ;;  %v4760_v6 = vmul.f32 %v5604_v41, %v4744_v29 }
 0x2b8   : > { %2623 = vst.msk [vmem:[#allocation3 + $0x10] sm:$0xff] %vm336_vm1, %v2614_v57  ;;  %v4768_v9 = vsub.f32 2.0, %v4760_v6  ;;  %v4661_v57 = vld [vmem:[#allocation4] sm:$0xff] }
 0x2b9   : > { %v5606_v30 = vpop.eup %5605  ;;  %v2583_v10 = vpop.xlane.xlu1 %2582 }
 0x2ba   : > { %v2615_v12 = vadd.f32 %v2607_v8, %v2583_v10  ;;  %v4776_v56 = vmul.f32 %v5604_v41, %v4768_v9  ;;  %v4761_v18 = vmul.f32 %v5606_v30, %v4745_v33 }
 0x2bc   : > { %2624 = vst.msk [vmem:[#allocation3 + $0x18] sm:$0xff] %vm336_vm1, %v2615_v12  ;;  %4794 = vperm.xlu1 %5570, %v4776_v56   ;;  %v4769_v13 = vsub.f32 2.0, %v4761_v18 }
 0x2be   : > { %v4777_v32 = vmul.f32 %v5606_v30, %v4769_v13 }
 0x2bf   : > { %v4746_v17 = vld [vmem:[#allocation3 + $0x10] sm:$0xff] }
 0x2c0   : > { %4799 = vperm.xlu0 %5569, %v4777_v32   ;;  %5607 = vrcp.f32 %v4746_v17 }
 0x2c3   : > { %v4747_v31 = vld [vmem:[#allocation3 + $0x18] sm:$0xff] }
 0x2c4   : > { %5609 = vrcp.f32 %v4747_v31 }
 0x2cd   : > { %v5608_v19 = vpop.eup %5607  ;;  %v2586_v34 = vpop.xlane.xlu0 %2585 }
 0x2ce   : > { %v2616_v22 = vadd.f32 %v2608_v16, %v2586_v34  ;;  %v4762_v1 = vmul.f32 %v5608_v19, %v4746_v17 }
 0x2d0   : > { %2625 = vst.msk [vmem:[#allocation3 + $0x20] sm:$0xff] %vm336_vm1, %v2616_v22  ;;  %v4770_v14 = vsub.f32 2.0, %v4762_v1 }
 0x2d1   : > { %v5610_v15 = vpop.eup %5609  ;;  %v2589_v35 = vpop.xlane.xlu1 %2588 }
 0x2d2   : > { %v2617_v26 = vadd.f32 %v2609_v62, %v2589_v35  ;;  %v4778_v52 = vmul.f32 %v5608_v19, %v4770_v14  ;;  %v4763_v37 = vmul.f32 %v5610_v15, %v4747_v31 }
 0x2d4   : > { %2626 = vst.msk [vmem:[#allocation3 + $0x28] sm:$0xff] %vm336_vm1, %v2617_v26  ;;  %4804 = vperm.xlu1 %5570, %v4778_v52   ;;  %v4771_v20 = vsub.f32 2.0, %v4763_v37 }
 0x2d6   : > { %v4779_v48 = vmul.f32 %v5610_v15, %v4771_v20 }
 0x2d7   : > { %v4748_v36 = vld [vmem:[#allocation3 + $0x20] sm:$0xff] }
 0x2d8   : > { %4809 = vperm.xlu0 %5569, %v4779_v48   ;;  %5611 = vrcp.f32 %v4748_v36 }
 0x2da   : > { %v5387_v7 = vpop.f32.mrf.mxu1 }
 0x2db   : > { %v4749_v24 = vld [vmem:[#allocation3 + $0x28] sm:$0xff] }
 0x2dc   : > { %5613 = vrcp.f32 %v4749_v24  ;;  %v2799_v21 = vpop.f32.mrf.mxu1 }
 0x2de   : > { %v5401_v25 = vpop.f32.mrf.mxu1 }
 0x2e0   : > { %v2963_v50 = vpop.f32.mrf.mxu1 }
 0x2e2   : > { %v5380_v27 = vpop.f32.mrf.mxu0 }
 0x2e3   : > { %v2806_v46 = vadd.f32 %v5387_v7, %v5380_v27  ;;  %v5415_v11 = vpop.f32.mrf.mxu1 }
 0x2e4   : > { %v2708_v28 = vpop.f32.mrf.mxu0 }
 0x2e5   : > { %v5612_v45 = vpop.eup %5611  ;;  %v2592_v47 = vpop.xlane.xlu0 %2591  ;;  %v2800_v58 = vadd.f32 %v2799_v21, %v2708_v28 }
 0x2e6   : > { %v2618_v51 = vadd.f32 %v2610_v43, %v2592_v47  ;;  %v5394_v53 = vpop.f32.mrf.mxu0  ;;  %v4764_v55 = vmul.f32 %v5612_v45, %v4748_v36  ;;  %v3127_v12 = vpop.f32.mrf.mxu1  ;;  %v4663_v47 = vld [vmem:[#allocation4 + $0x10] sm:$0xff] }
 0x2e7   : > { %v2889_v61 = vadd.f32 %v5394_v53, %v2806_v46 }
 0x2e8   : > { %2627 = vst.msk [vmem:[#allocation3 + $0x30] sm:$0xff] %vm336_vm1, %v2618_v51  ;;  %v2881_v63 = vpop.f32.mrf.mxu0  ;;  %v4772_v2 = vsub.f32 2.0, %v4764_v55 }
 0x2e9   : > { %v5614_v3 = vpop.eup %5613  ;;  %v2882_v4 = vadd.f32 %v2881_v63, %v2800_v58  ;;  %v2595_v5 = vpop.xlane.xlu1 %2594  ;;  %v2972_v59 = vadd.f32 %v5401_v25, %v2889_v61 }
 0x2ea   : > { %v2619_v29 = vadd.f32 %v2611_v0, %v2595_v5  ;;  %v5408_v33 = vpop.f32.mrf.mxu0  ;;  %v4780_v38 = vmul.f32 %v5612_v45, %v4772_v2  ;;  %v4765_v40 = vmul.f32 %v5614_v3, %v4749_v24 }
 0x2eb   : > { %v3055_v41 = vadd.f32 %v5408_v33, %v2972_v59  ;;  %v2964_v42 = vadd.f32 %v2963_v50, %v2882_v4 }
 0x2ec   : > { %2628 = vst.msk [vmem:[#allocation3 + $0x38] sm:$0xff] %vm336_vm1, %v2619_v29  ;;  %v3048_v6 = vpop.f32.mrf.mxu0  ;;  %4814 = vperm.xlu1 %5570, %v4780_v38   ;;  %v4773_v8 = vsub.f32 2.0, %v4765_v40 }
 0x2ed   : > { %v3134_v60 = vadd.f32 %v5415_v11, %v3055_v41  ;;  %v3049_v9 = vadd.f32 %v3048_v6, %v2964_v42  ;;  %v4677_v30 = vpop.permute.xlu1 %4676  ;;  %v4672_v10 = vpop.permute.xlu0 %4671 }
 0x2ee   : > { %v4710_v56 = vmul.f32 %v4677_v30, %v4662_v44  ;;  %v4709_v18 = vmul.f32 %v4672_v10, %v4661_v57  ;;  %v4781_v13 = vmul.f32 %v5614_v3, %v4773_v8 }
 0x2ef   : > { %v3128_v32 = vadd.f32 %v3127_v12, %v3049_v9  ;;  %v4750_v17 = vld [vmem:[#allocation3 + $0x30] sm:$0xff]  ;;  %v4666_v9 = vld [vmem:[#allocation4 + $0x28] sm:$0xff] }
 0x2f0   : > { %v4718_v31 = vadd.f32 %v4710_v56, %v3134_v60  ;;  %4819 = vperm.xlu0 %5569, %v4781_v13   ;;  %5615 = vrcp.f32 %v4750_v17 }
 0x2f1   : > { %v4717_v54 = vadd.f32 %v4709_v18, %v3128_v32  ;;  %v4687_v7 = vpop.permute.xlu0 %4686  ;;  %v4682_v49 = vpop.permute.xlu1 %4681  ;;  %v4665_v18 = vld [vmem:[#allocation4 + $0x20] sm:$0xff] }
 0x2f2   : > { %4726 = vst.msk [vmem:[#allocation4 + $0x8] sm:$0xff] %vm353_vm0, %v4718_v31  ;;  %v5429_v16 = vpop.f32.mrf.mxu1  ;;  %v4712_v53 = vmul.f32 %v4687_v7, %v4664_v23  ;;  %v4711_v0 = vmul.f32 %v4682_v49, %v4663_v47  ;;  %v4668_v23 = vld [vmem:[#allocation4 + $0x38] sm:$0xff] }
 0x2f3   : > { %4725 = vst.msk [vmem:[#allocation4] sm:$0xff] %vm353_vm0, %v4717_v54  ;;  %v4751_v19 = vld [vmem:[#allocation3 + $0x38] sm:$0xff] }
 0x2f4   : > { %5617 = vrcp.f32 %v4751_v19  ;;  %v3307_v34 = vpop.f32.mrf.mxu1 }
 0x2f5   : > { %v4697_v6 = vpop.permute.xlu0 %4696  ;;  %v4692_v13 = vpop.permute.xlu1 %4691 }
 0x2f6   : > { %v5443_v39 = vpop.f32.mrf.mxu1 }
 0x2f8   : > { %v3471_v15 = vpop.f32.mrf.mxu1 }
 0x2f9   : > { %v4707_v7 = vpop.permute.xlu0 %4706 }
 0x2fa   : > { %v5422_v22 = vpop.f32.mrf.mxu0  ;;  %v4716_v49 = vmul.f32 %v4707_v7, %v4668_v23 }
 0x2fb   : > { %v3314_v14 = vadd.f32 %v5429_v16, %v5422_v22  ;;  %v5457_v25 = vpop.f32.mrf.mxu1 }
 0x2fc   : > { %v3216_v1 = vpop.f32.mrf.mxu0 }
 0x2fd   : > { %v5616_v62 = vpop.eup %5615  ;;  %v3308_v52 = vadd.f32 %v3307_v34, %v3216_v1  ;;  %v3635_v61 = vpop.f32.mrf.mxu1 }
 0x2fe   : > { %v5436_v35 = vpop.f32.mrf.mxu0  ;;  %v4766_v26 = vmul.f32 %v5616_v62, %v4750_v17  ;;  %v4714_v17 = vmul.f32 %v4697_v6, %v4666_v9 }
 0x2ff   : > { %v3397_v37 = vadd.f32 %v5436_v35, %v3314_v14 }
 0x300   : > { %v3389_v20 = vpop.f32.mrf.mxu0  ;;  %v4774_v48 = vsub.f32 2.0, %v4766_v26 }
 0x301   : > { %v5618_v36 = vpop.eup %5617  ;;  %v3390_v24 = vadd.f32 %v3389_v20, %v3308_v52  ;;  %v3480_v21 = vadd.f32 %v5443_v39, %v3397_v37 }
 0x302   : > { %v5450_v27 = vpop.f32.mrf.mxu0  ;;  %v4782_v28 = vmul.f32 %v5616_v62, %v4774_v48  ;;  %v4767_v43 = vmul.f32 %v5618_v36, %v4751_v19  ;;  %v4713_v19 = vmul.f32 %v4692_v13, %v4665_v18 }
 0x303   : > { %v3563_v45 = vadd.f32 %v5450_v27, %v3480_v21  ;;  %v3472_v46 = vadd.f32 %v3471_v15, %v3390_v24 }
 0x304   : > { %v3556_v50 = vpop.f32.mrf.mxu0  ;;  %4824 = vperm.xlu1 %5570, %v4782_v28   ;;  %v4775_v51 = vsub.f32 2.0, %v4767_v43  ;;  %v4702_v28 = vpop.permute.xlu1 %4701 }
 0x305   : > { %v3642_v55 = vadd.f32 %v5457_v25, %v3563_v45  ;;  %v3557_v58 = vadd.f32 %v3556_v50, %v3472_v46  ;;  %v4667_v46 = vld [vmem:[#allocation4 + $0x30] sm:$0xff] }
 0x306   : > { %v4783_v63 = vmul.f32 %v5618_v36, %v4775_v51 }
 0x307   : > { %v4720_v2 = vadd.f32 %v4712_v53, %v3642_v55  ;;  %v3636_v3 = vadd.f32 %v3635_v61, %v3557_v58  ;;  %v4715_v55 = vmul.f32 %v4702_v28, %v4667_v46 }
 0x308   : > { %4829 = vperm.xlu0 %5569, %v4783_v63  }
 0x309   : > { %4728 = vst.msk [vmem:[#allocation4 + $0x18] sm:$0xff] %vm353_vm0, %v4720_v2  ;;  %v4719_v4 = vadd.f32 %v4711_v0, %v3636_v3  ;;  %v4784_v0 = vld [vmem:[#allocation4] sm:$0xff] }
 0x30a   : > { %v5471_v5 = vpop.f32.mrf.mxu1 }
 0x30b   : > { %4727 = vst.msk [vmem:[#allocation4 + $0x10] sm:$0xff] %vm353_vm0, %v4719_v4  ;;  %v4785_v4 = vld [vmem:[#allocation4 + $0x8] sm:$0xff] }
 0x30c   : > { %v3815_v59 = vpop.f32.mrf.mxu1 }
 0x30e   : > { %v5485_v11 = vpop.f32.mrf.mxu1 }
 0x310   : > { %v3979_v40 = vpop.f32.mrf.mxu1 }
 0x312   : > { %v5464_v29 = vpop.f32.mrf.mxu0 }
 0x313   : > { %v3822_v38 = vadd.f32 %v5471_v5, %v5464_v29  ;;  %v5499_v30 = vpop.f32.mrf.mxu1 }
 0x314   : > { %v3724_v33 = vpop.f32.mrf.mxu0 }
 0x315   : > { %v3816_v42 = vadd.f32 %v3815_v59, %v3724_v33  ;;  %v4143_v16 = vpop.f32.mrf.mxu1 }
 0x316   : > { %v5478_v41 = vpop.f32.mrf.mxu0 }
 0x317   : > { %v3905_v44 = vadd.f32 %v5478_v41, %v3822_v38  ;;  %v4787_v38 = vld [vmem:[#allocation4 + $0x18] sm:$0xff] }
 0x318   : > { %v3897_v57 = vpop.f32.mrf.mxu0 }
 0x319   : > { %v3898_v8 = vadd.f32 %v3897_v57, %v3816_v42  ;;  %v3988_v60 = vadd.f32 %v5485_v11, %v3905_v44  ;;  %v4786_v11 = vld [vmem:[#allocation4 + $0x10] sm:$0xff] }
 0x31a   : > { %v5492_v10 = vpop.f32.mrf.mxu0 }
 0x31b   : > { %v4071_v12 = vadd.f32 %v5492_v10, %v3988_v60  ;;  %v3980_v56 = vadd.f32 %v3979_v40, %v3898_v8 }
 0x31c   : > { %v4064_v32 = vpop.f32.mrf.mxu0 }
 0x31d   : > { %v4150_v31 = vadd.f32 %v5499_v30, %v4071_v12  ;;  %v4065_v54 = vadd.f32 %v4064_v32, %v3980_v56 }
 0x31f   : > { %v4722_v34 = vadd.f32 %v4714_v17, %v4150_v31  ;;  %v4144_v39 = vadd.f32 %v4143_v16, %v4065_v54 }
 0x321   : > { %4730 = vst.msk [vmem:[#allocation4 + $0x28] sm:$0xff] %vm353_vm0, %v4722_v34  ;;  %v4721_v22 = vadd.f32 %v4713_v19, %v4144_v39 }
 0x322   : > { %v5513_v1 = vpop.f32.mrf.mxu1 }
 0x323   : > { %4729 = vst.msk [vmem:[#allocation4 + $0x20] sm:$0xff] %vm353_vm0, %v4721_v22 }
 0x324   : > { %v4323_v62 = vpop.f32.mrf.mxu1 }
 0x326   : > { %v5527_v14 = vpop.f32.mrf.mxu1 }
 0x328   : > { %v4487_v52 = vpop.f32.mrf.mxu1  ;;  %v4789_v6 = vld [vmem:[#allocation4 + $0x28] sm:$0xff] }
 0x32a   : > { %v5506_v15 = vpop.f32.mrf.mxu0  ;;  %v4788_v42 = vld [vmem:[#allocation4 + $0x20] sm:$0xff] }
 0x32b   : > { %v4330_v26 = vadd.f32 %v5513_v1, %v5506_v15  ;;  %v5541_v25 = vpop.f32.mrf.mxu1 }
 0x32c   : > { %v4232_v35 = vpop.f32.mrf.mxu0 }
 0x32d   : > { %v4324_v20 = vadd.f32 %v4323_v62, %v4232_v35  ;;  %v4651_v53 = vpop.f32.mrf.mxu1 }
 0x32e   : > { %v5520_v37 = vpop.f32.mrf.mxu0 }
 0x32f   : > { %v4413_v48 = vadd.f32 %v5520_v37, %v4330_v26 }
 0x330   : > { %v4405_v36 = vpop.f32.mrf.mxu0 }
 0x331   : > { %v4406_v24 = vadd.f32 %v4405_v36, %v4324_v20  ;;  %v4496_v21 = vadd.f32 %v5527_v14, %v4413_v48 }
 0x332   : > { %v5534_v27 = vpop.f32.mrf.mxu0 }
 0x333   : > { %v4579_v43 = vadd.f32 %v5534_v27, %v4496_v21  ;;  %v4488_v45 = vadd.f32 %v4487_v52, %v4406_v24 }
 0x334   : > { %v4572_v47 = vpop.f32.mrf.mxu0 }
 0x335   : > { %v4658_v50 = vadd.f32 %v5541_v25, %v4579_v43  ;;  %v4573_v51 = vadd.f32 %v4572_v47, %v4488_v45 }
 0x337   : > { %v4724_v58 = vadd.f32 %v4716_v49, %v4658_v50  ;;  %v4652_v61 = vadd.f32 %v4651_v53, %v4573_v51  ;;  %v4795_v63 = vpop.permute.xlu1 %4794 }
 0x338   : > { %v4832_v2 = vmul.f32 %v4795_v63, %v4784_v0 }
 0x339   : > { %4732 = vst.msk [vmem:[#allocation4 + $0x38] sm:$0xff] %vm353_vm0, %v4724_v58  ;;  %v4723_v3 = vadd.f32 %v4715_v55, %v4652_v61 }
 0x33a   : > { %4840 = vst.msk [vmem:[%s6275_s28] sm:$0xff] %vm353_vm0, %v4832_v2 }
 0x33b   : > { %4731 = vst.msk [vmem:[#allocation4 + $0x30] sm:$0xff] %vm353_vm0, %v4723_v3  ;;  %v4800_v5 = vpop.permute.xlu0 %4799 }
 0x33c   : > { %v4833_v59 = vmul.f32 %v4800_v5, %v4785_v4 }
 0x33e   : > { %4841 = vst.msk [vmem:[%s6275_s28 + $0x8] sm:$0xff] %vm353_vm0, %v4833_v59 }
 0x340   : > { %v4791_v12 = vld [vmem:[#allocation4 + $0x38] sm:$0xff] }
 0x342   : > { %v4790_v9 = vld [vmem:[#allocation4 + $0x30] sm:$0xff] }
 0x34f   : > { %v4805_v29 = vpop.permute.xlu1 %4804 }
 0x350   : > { %v4834_v33 = vmul.f32 %v4805_v29, %v4786_v11 }
 0x352   : > { %4842 = vst.msk [vmem:[%s6275_s28 + $0x10] sm:$0xff] %vm353_vm0, %v4834_v33 }
 0x353   : > { %v4810_v40 = vpop.permute.xlu0 %4809 }
 0x354   : > { %v4835_v41 = vmul.f32 %v4810_v40, %v4787_v38 }
 0x356   : > { %4843 = vst.msk [vmem:[%s6275_s28 + $0x18] sm:$0xff] %vm353_vm0, %v4835_v41 }
 0x367   : > { %v4815_v44 = vpop.permute.xlu1 %4814 }
 0x368   : > { %v4836_v57 = vmul.f32 %v4815_v44, %v4788_v42 }
 0x36a   : > { %4844 = vst.msk [vmem:[%s6275_s28 + $0x20] sm:$0xff] %vm353_vm0, %v4836_v57 }
 0x36b   : > { %v4820_v8 = vpop.permute.xlu0 %4819 }
 0x36c   : > { %v4837_v60 = vmul.f32 %v4820_v8, %v4789_v6 }
 0x36e   : > { %4845 = vst.msk [vmem:[%s6275_s28 + $0x28] sm:$0xff] %vm353_vm0, %v4837_v60 }
 0x37f   : > { %v4825_v30 = vpop.permute.xlu1 %4824 }
 0x380   : > { %v4838_v10 = vmul.f32 %v4825_v30, %v4790_v9 }
 0x382   : > { %4846 = vst.msk [vmem:[%s6275_s28 + $0x30] sm:$0xff] %vm353_vm0, %v4838_v10 }
 0x383   : > { %v4830_v56 = vpop.permute.xlu0 %4829 }
 0x384   : > { %v4839_v18 = vmul.f32 %v4830_v56, %v4791_v12 }
 0x386   : > { %4847 = vst.msk [vmem:[%s6275_s28 + $0x38] sm:$0xff] %vm353_vm0, %v4839_v18 }
 0x387 PF: > { %s13_s14 = sadd.s32 1, %s5641_s14   ;;  %s6308_s12 = smov %s5637_s13 }
 0x388   : > { %p10_p5 = scmp.ge.s32.totalorder %s13_s14, 4   ;;  %s6309_s13 = smov %s6311_s15 }
 0x38a   :  { %12 = sbr.rel (!%p10_p5) target bundleno = 2 (0x2), region = 76 }

</bundles_post_ra>
